<compile_context>
chip_gen: v6e
topology: v6e:2x2x1
jax: 0.10.0
libtpu: 0.0.40
codegen_flags: <defaults>
</compile_context>

<pallas_src>
import functools
import math

import numpy as np
import jax
import jax.numpy as jnp
from jax import lax
from jax.experimental import pallas as pl
from jax.experimental.pallas import tpu as pltpu

MAX_POINTS = 40
D_MODEL = 256
NTOKEN = 128 * 128 + 2          # 16386
NHEAD = 4
NLAYERS = 6
DIM_FF = 2048                   # nn.TransformerEncoderLayer default
START_TOKEN = 16384
STOP_TOKEN = 16385
PAD_ID = 16386
LN_EPS = 1e-5

FF_TN = 512                     # tile for the (256, 2048) FFN matmul
PROJ_TN = 2752                  # tile for the vocab projection (6 grid steps)
PROJ_NP = (-(-NTOKEN // PROJ_TN)) * PROJ_TN   # 16512 (multiple of 128 & PROJ_TN)


# ---------------------------------------------------------------------------
# Pallas kernels
# ---------------------------------------------------------------------------
def _linear_kernel(x_ref, w_ref, b_ref, o_ref, *, relu):
    x = x_ref[...]
    w = w_ref[...]
    if x.dtype != w.dtype:          # bf16 weights: cast MXU operand only
        x = x.astype(w.dtype)
    y = jnp.dot(x, w, preferred_element_type=jnp.float32) + b_ref[...]
    if relu:
        y = jnp.maximum(y, 0.0)
    o_ref[...] = y.astype(o_ref.dtype)


@functools.partial(jax.jit, static_argnames=("relu", "tn", "n_out"))
def linear(x2d, w, b, *, relu=False, tn=0, n_out=0):
    """y = x @ w + b.  w (K, Np) / b (1, Np) are pre-padded at init so the
    lane dim is a multiple of 128 (and covers grid*tn columns)."""
    M, K = x2d.shape
    Np = w.shape[1]
    if n_out == 0:
        n_out = Np
    if tn == 0 or tn > Np:
        tn = Np
    grid = pl.cdiv(n_out, tn)
    assert grid * tn <= Np, (n_out, tn, Np)
    return pl.pallas_call(
        functools.partial(_linear_kernel, relu=relu),
        out_shape=jax.ShapeDtypeStruct((M, n_out), jnp.float32),
        grid=(grid,),
        in_specs=[
            pl.BlockSpec((M, K), lambda j: (0, 0)),
            pl.BlockSpec((K, tn), lambda j: (0, j)),
            pl.BlockSpec((1, tn), lambda j: (0, j)),
        ],
        out_specs=pl.BlockSpec((M, tn), lambda j: (0, j)),
        compiler_params=pltpu.CompilerParams(
            dimension_semantics=("parallel",) if grid > 1 else ("arbitrary",)),
    )(x2d, w, b)


def _linear_add_ln_kernel(x_ref, w_ref, b_ref, r_ref, g_ref, bb_ref, o_ref):
    y = jnp.dot(x_ref[...], w_ref[...], preferred_element_type=jnp.float32)
    z = y + b_ref[...] + r_ref[...]
    mu = jnp.mean(z, axis=-1, keepdims=True)
    zc = z - mu
    var = jnp.mean(zc * zc, axis=-1, keepdims=True)
    inv = lax.rsqrt(var + LN_EPS)
    o_ref[...] = (zc * inv * g_ref[...] + bb_ref[...]).astype(o_ref.dtype)


@jax.jit
def linear_add_ln(x2d, w, b, res2d, gamma, beta):
    """LayerNorm(res + (x @ w + b)) fused into one kernel (post-norm layers)."""
    M, K = x2d.shape
    N = w.shape[1]
    return pl.pallas_call(
        _linear_add_ln_kernel,
        out_shape=jax.ShapeDtypeStruct((M, N), jnp.float32),
        grid=(1,),
        in_specs=[
            pl.BlockSpec((M, K), lambda i: (0, 0)),
            pl.BlockSpec((K, N), lambda i: (0, 0)),
            pl.BlockSpec((1, N), lambda i: (0, 0)),
            pl.BlockSpec((M, N), lambda i: (0, 0)),
            pl.BlockSpec((1, N), lambda i: (0, 0)),
            pl.BlockSpec((1, N), lambda i: (0, 0)),
        ],
        out_specs=pl.BlockSpec((M, N), lambda i: (0, 0)),
    )(x2d, w, b, res2d, gamma, beta)


def _attn_kernel(q_ref, k_ref, v_ref, bias_ref, o_ref, *, nhead, scale):
    """One batch element; heads batched in-kernel; lane-dense (Sq, H*Dh) out."""
    D = q_ref.shape[-1]
    dh = D // nhead
    bias = bias_ref[0]                                       # (Sq, Sk)
    ctx = []
    for h in range(nhead):
        q = q_ref[0, :, h * dh:(h + 1) * dh]                 # (Sq, Dh)
        k = k_ref[0, :, h * dh:(h + 1) * dh]                 # (Sk, Dh)
        v = v_ref[0, :, h * dh:(h + 1) * dh]                 # (Sk, Dh)
        s = lax.dot_general(q, k, (((1,), (1,)), ((), ())),
                            preferred_element_type=jnp.float32)
        s = s * scale + bias
        s = s - jnp.max(s, axis=-1, keepdims=True)
        p = jnp.exp(s)
        p = p * pl.reciprocal(jnp.sum(p, axis=-1, keepdims=True), approx=True)
        ctx.append(jnp.dot(p, v, preferred_element_type=jnp.float32))
    o_ref[0] = jnp.concatenate(ctx, axis=-1).astype(o_ref.dtype)


@functools.partial(jax.jit, static_argnames=("nhead",))
def attention(q, k, v, bias, *, nhead):
    """q: (B, Sq, D), k/v: (B, Sk, D), bias: (B, Sq, Sk) additive.  -> (B, Sq, D)."""
    B, Sq, D = q.shape
    Sk = k.shape[1]
    scale = 1.0 / math.sqrt(D // nhead)
    return pl.pallas_call(
        functools.partial(_attn_kernel, nhead=nhead, scale=scale),
        out_shape=jax.ShapeDtypeStruct((B, Sq, D), jnp.float32),
        grid=(B,),
        in_specs=[
            pl.BlockSpec((1, Sq, D), lambda i: (i, 0, 0)),
            pl.BlockSpec((1, Sk, D), lambda i: (i, 0, 0)),
            pl.BlockSpec((1, Sk, D), lambda i: (i, 0, 0)),
            pl.BlockSpec((1, Sq, Sk), lambda i: (i, 0, 0)),
        ],
        out_specs=pl.BlockSpec((1, Sq, D), lambda i: (i, 0, 0)),
        compiler_params=pltpu.CompilerParams(dimension_semantics=("parallel",)),
    )(q, k, v, bias)


# ---------------------------------------------------------------------------
# Transformer built from the kernels above (batch-major (B, S, D) internally)
# ---------------------------------------------------------------------------
def self_attention_block(x_bsd, p, bias):
    B, S, D = x_bsd.shape
    qkv = linear(x_bsd.reshape(B * S, D), p["wqkv"], p["bqkv"])   # fused QKV
    qkv = qkv.reshape(B, S, 3, D)
    ctx = attention(qkv[:, :, 0], qkv[:, :, 1], qkv[:, :, 2], bias, nhead=NHEAD)
    return ctx.reshape(B * S, D)


def cross_attention_block(x_bsd, mem_bsd, p, bias):
    B, Sq, D = x_bsd.shape
    Sk = mem_bsd.shape[1]
    q = linear(x_bsd.reshape(B * Sq, D), p["wq"], p["bq"]).reshape(B, Sq, D)
    kv = linear(mem_bsd.reshape(B * Sk, D), p["wkv"], p["bkv"]).reshape(B, Sk, 2, D)
    ctx = attention(q, kv[:, :, 0], kv[:, :, 1], bias, nhead=NHEAD)
    return ctx.reshape(B * Sq, D)


def encoder_layer_fwd(x_bsd, p, bias):
    B, S, D = x_bsd.shape
    x2d = x_bsd.reshape(B * S, D)
    sa = self_attention_block(x_bsd, p["self_attn"], bias)
    x1 = linear_add_ln(sa, p["self_attn"]["wo"], p["self_attn"]["bo"],
                       x2d, p["ln1_g"], p["ln1_b"])
    h = linear(x1, p["ff1_w"], p["ff1_b"], relu=True, tn=FF_TN)
    x2 = linear_add_ln(h, p["ff2_w"], p["ff2_b"], x1, p["ln2_g"], p["ln2_b"])
    return x2.reshape(B, S, D)


def decoder_layer_fwd(x_bsd, mem_bsd, p, self_bias, cross_bias):
    B, S, D = x_bsd.shape
    x2d = x_bsd.reshape(B * S, D)
    sa = self_attention_block(x_bsd, p["self_attn"], self_bias)
    x1 = linear_add_ln(sa, p["self_attn"]["wo"], p["self_attn"]["bo"],
                       x2d, p["ln1_g"], p["ln1_b"])
    ca = cross_attention_block(x1.reshape(B, S, D), mem_bsd, p["cross_attn"],
                               cross_bias)
    x2 = linear_add_ln(ca, p["cross_attn"]["wo"], p["cross_attn"]["bo"],
                       x1, p["ln2_g"], p["ln2_b"])
    h = linear(x2, p["ff1_w"], p["ff1_b"], relu=True, tn=FF_TN)
    x3 = linear_add_ln(h, p["ff2_w"], p["ff2_b"], x2, p["ln3_g"], p["ln3_b"])
    return x3.reshape(B, S, D)


@jax.jit
def transformer_forward(params, enc_seq, enc_bias, dec_seq, dec_bias, cross_bias):
    memory = enc_seq
    for lp in params["encoder"]:
        memory = encoder_layer_fwd(memory, lp, enc_bias)
    x = dec_seq
    for lp in params["decoder"]:
        x = decoder_layer_fwd(x, memory, lp, dec_bias, cross_bias)
    B, S, D = x.shape
    flat = x.transpose(1, 0, 2).reshape(S * B, D)             # back to (S, B) order
    op_deq = linear(flat, params["project_w"], params["project_b"],
                    n_out=NTOKEN, tn=PROJ_TN)                 # ragged last block
    op_coord = linear(flat, params["project_coord_w"],
                      params["project_coord_b"])[:, :2]
    return op_deq.reshape(S, B, NTOKEN), op_coord.reshape(S, B, 2)


# ---------------------------------------------------------------------------
# Hourglass stand-in (backbone not defined in the provided source file)
# ---------------------------------------------------------------------------
def conv1x1(x_nchw, w, b, n_out):
    N, C, H, W = x_nchw.shape
    xm = x_nchw.transpose(0, 2, 3, 1).reshape(N * H * W, C)
    y = linear(xm, w, b)[:, :n_out]
    return y.reshape(N, H, W, n_out).transpose(0, 3, 1, 2)


def hourglass_stub(params, x):
    # TODO(synk): real HourglassNet/Bottleneck backbone is not defined in the
    # provided module; stand-in = two 1x1 convs (Pallas matmuls) producing the
    # 2-channel heatmap and the 256-channel feature map the rest of forward uses.
    hm = conv1x1(x, params["hg_hm_w"], params["hg_hm_b"], 2)          # (N, 2, H, W)
    feat = conv1x1(x, params["hg_feat_w"], params["hg_feat_b"], D_MODEL)
    return hm, [feat]


# ---------------------------------------------------------------------------
# Sequence construction (numpy index arrays + a few device ops)
# ---------------------------------------------------------------------------
def build_line_arrays(point_list, pt_idx):
    recs = []
    for img, (pts, counts) in enumerate(zip(point_list, pt_idx)):
        off = 0
        for c in counts:
            line_pts = pts[off:off + c]
            off += c
            n = min(c, MAX_POINTS)
            line_pts = line_pts[:n]
            recs.append((img, n,
                         [p[0] * 128 + p[1] for p in line_pts],
                         [p[0] for p in line_pts],
                         [p[1] for p in line_pts]))
    L = len(recs)
    counts = np.array([r[1] for r in recs], np.int32)
    imgi = np.array([r[0] for r in recs], np.int32)
    ids = np.zeros((L, MAX_POINTS), np.int32)
    xs = np.zeros((L, MAX_POINTS), np.int32)
    ys = np.zeros((L, MAX_POINTS), np.int32)
    for l, (_, n, id_, x_, y_) in enumerate(recs):
        ids[l, :n] = id_
        xs[l, :n] = x_
        ys[l, :n] = y_
    valid = np.arange(MAX_POINTS)[None, :] < counts[:, None]
    pad_mask = np.arange(MAX_POINTS + 2)[None, :] >= (counts[:, None] + 2)
    return dict(L=L, counts=counts, imgi=imgi, ids=ids, xs=xs, ys=ys,
                valid=valid, pad_mask=pad_mask)


def _assemble_seq(body, emb, counts):
    L = body.shape[0]
    start_e = emb[START_TOKEN]
    stop_e = emb[STOP_TOKEN]
    seq = jnp.zeros((L, MAX_POINTS + 2, D_MODEL), jnp.float32)
    seq = seq.at[:, 1:MAX_POINTS + 1, :].set(body)
    seq = seq.at[:, 0, :].set(start_e)
    seq = seq.at[np.arange(L), counts + 1].set(stop_e)
    return seq


def _pad_bias(pad_mask_np, sq):
    bias = np.where(pad_mask_np[:, None, :], -1e9, 0.0).astype(np.float32)
    return np.ascontiguousarray(
        np.broadcast_to(bias, (pad_mask_np.shape[0], sq, pad_mask_np.shape[1])))


def get_encoder_sequence(params, x_, la):
    maps = x_[-1]                                              # (N, C, H, W)
    N, C, H, W = maps.shape
    flat = maps.transpose(0, 2, 3, 1).reshape(N * H * W, C)
    gidx = (la["imgi"][:, None] * (H * W) + la["xs"] * W + la["ys"]).reshape(-1)
    feat = jnp.take(flat, jnp.asarray(gidx), axis=0).reshape(la["L"], MAX_POINTS, C)
    emb = params["e_lookup"]
    pos = jnp.take(emb, jnp.asarray(la["ids"].reshape(-1)),
                   axis=0).reshape(la["L"], MAX_POINTS, D_MODEL)
    body = (feat + pos) * jnp.asarray(la["valid"], jnp.float32)[:, :, None]
    seq = _assemble_seq(body, emb, la["counts"])               # (L, 42, 256)
    enc_bias = _pad_bias(la["pad_mask"], MAX_POINTS + 2)       # src_mask is all-False
    return seq, jnp.asarray(enc_bias)


def get_decoder_sequence(params, la):
    emb = params["e_lookup"]
    pos = jnp.take(emb, jnp.asarray(la["ids"].reshape(-1)),
                   axis=0).reshape(la["L"], MAX_POINTS, D_MODEL)
    body = pos * jnp.asarray(la["valid"], jnp.float32)[:, :, None]
    seq = _assemble_seq(body, emb, la["counts"])               # (L, 42, 256)
    labels = np.full((la["L"], MAX_POINTS + 1), PAD_ID, np.int32)
    for l in range(la["L"]):
        n = int(la["counts"][l])
        labels[l, :n] = la["ids"][l, :n]
        labels[l, n] = STOP_TOKEN
    return seq, jnp.asarray(labels)


# ---------------------------------------------------------------------------
# Mlm.forward
# ---------------------------------------------------------------------------
def mlm_forward(params, x, edge_list, point_list_, point_norm_list, split, decoder_loss):
    hm, x_ = hourglass_stub(params, x)
    if not decoder_loss:
        return {"hm": hm, "type": "transformer", "decoder_loss": decoder_loss}
    la = build_line_arrays(*point_list_)
    enc_seq, enc_bias = get_encoder_sequence(params, x_, la)
    dec_seq, labels = get_decoder_sequence(params, la)
    if split != "test":
        sd = MAX_POINTS + 1                                    # 41 decoder positions
        dec_in = dec_seq[:, :-1, :]                            # deq[:-1] (seq dim)
        dec_bias = jnp.asarray(_pad_bias(la["pad_mask"][:, :sd], sd))
        cross_bias = jnp.zeros((la["L"], sd, MAX_POINTS + 2), jnp.float32)
        op_deq, op_coord = transformer_forward(params, enc_seq, enc_bias,
                                               dec_in, dec_bias, cross_bias)
        return {"hm": hm, "deq": op_deq, "cor": op_coord,
                "pnl": (point_norm_list, point_list_[1]),
                "type": "transformer", "decoder_loss": decoder_loss,
                "dec_label": labels}
    # TODO(synk): decode_lines_pointwise greedy/autoregressive test-mode loop
    # (python control flow + prints + exit()) is host-side and not translated.
    raise NotImplementedError


# ---------------------------------------------------------------------------
# Deterministic parameter init (weights pre-padded / pre-fused once here)
# ---------------------------------------------------------------------------
def init_params(key):
    keys = list(jax.random.split(key, 256))
    it = iter(keys)

    def nrm(shape, scale=0.02):
        return jax.random.normal(next(it), shape, jnp.float32) * scale

    def row(n):
        return jnp.zeros((1, n), jnp.float32)

    def pad_cols(w, np_cols):
        k, n = w.shape
        return jnp.zeros((k, np_cols), jnp.float32).at[:, :n].set(w)

    def mha_self():
        return dict(wqkv=nrm((D_MODEL, 3 * D_MODEL)), bqkv=row(3 * D_MODEL),
                    wo=nrm((D_MODEL, D_MODEL)), bo=row(D_MODEL))

    def mha_cross():
        return dict(wq=nrm((D_MODEL, D_MODEL)), bq=row(D_MODEL),
                    wkv=nrm((D_MODEL, 2 * D_MODEL)), bkv=row(2 * D_MODEL),
                    wo=nrm((D_MODEL, D_MODEL)), bo=row(D_MODEL))

    def ff_ln(n_ln):
        p = dict(ff1_w=nrm((D_MODEL, DIM_FF)), ff1_b=row(DIM_FF),
                 ff2_w=nrm((DIM_FF, D_MODEL)), ff2_b=row(D_MODEL))
        for i in range(1, n_ln + 1):
            p[f"ln{i}_g"] = jnp.ones((1, D_MODEL), jnp.float32)
            p[f"ln{i}_b"] = jnp.zeros((1, D_MODEL), jnp.float32)
        return p

    # vocab projection: pre-padded to a multiple of PROJ_TN, weight in bf16
    # (MXU operands only; all epilogue math stays f32 -> v5e-safe).
    proj_w = pad_cols(nrm((D_MODEL, NTOKEN)), PROJ_NP).astype(jnp.bfloat16)

    params = dict(
        hg_hm_w=pad_cols(nrm((3, 2)), 128), hg_hm_b=row(128),
        hg_feat_w=nrm((3, D_MODEL)), hg_feat_b=row(D_MODEL),
        e_lookup=nrm((NTOKEN, D_MODEL)),
        project_w=proj_w, project_b=row(PROJ_NP),
        project_coord_w=pad_cols(nrm((D_MODEL, 2)), 128), project_coord_b=row(128),
        encoder=[dict(self_attn=mha_self(), **ff_ln(2)) for _ in range(NLAYERS)],
        decoder=[dict(self_attn=mha_self(), cross_attn=mha_cross(), **ff_ln(3))
                 for _ in range(NLAYERS)],
    )
    return params


# ---------------------------------------------------------------------------
if __name__ == "__main__":
    key = jax.random.PRNGKey(0)
    k_params, k_img = jax.random.split(key)
    params = init_params(k_params)

    # small image, NCHW, 3 input channels; spatial 32 so point coords < 32 < 128
    x_img = jax.random.normal(k_img, (2, 3, 32, 32), jnp.float32)

    # deterministic synthetic point lists: 2 images, 4 lines, 14 points total
    point_list = [
        [(3, 5), (7, 9), (11, 2), (1, 1), (2, 3), (4, 6), (8, 8), (10, 12)],
        [(5, 5), (6, 7), (9, 3), (12, 1), (2, 2), (14, 9)],
    ]
    pt_idx = [[3, 5], [4, 2]]           # split sizes per image (lines)
    point_list_ = (point_list, pt_idx)
    point_norm_list = point_list        # only forwarded through the output dict

    out = mlm_forward(params, x_img, edge_list=None, point_list_=point_list_,
                      point_norm_list=point_norm_list, split="train",
                      decoder_loss=True)

    jax.block_until_ready((out["hm"], out["deq"], out["cor"], out["dec_label"]))
    assert out["hm"].shape == (2, 2, 32, 32)
    assert out["deq"].shape == (MAX_POINTS + 1, 4, NTOKEN)
    assert out["cor"].shape == (MAX_POINTS + 1, 4, 2)
    assert out["dec_label"].shape == (4, MAX_POINTS + 1)
    print("KERNEL_OK")
</pallas_src>

<mosaic_0001>
module attributes {stable_mosaic.version = 11 : i64} {
  func.func @_linear_kernel(%arg0: i32, %arg1: memref<2048x3xf32, #tpu.memory_space<vmem>>, %arg2: memref<3x128xf32, #tpu.memory_space<vmem>>, %arg3: memref<1x128xf32, #tpu.memory_space<vmem>>, %arg4: memref<2048x128xf32, #tpu.memory_space<vmem>>) attributes {dimension_semantics = [#tpu.dimension_semantics<arbitrary>], iteration_bounds = array<i64: 1>, scalar_prefetch = 0 : i64, scratch_operands = 0 : i64, tpu.core_type = #tpu.core_type<tc>, window_params = [{pipeline_mode = #tpu.pipeline_mode<synchronous>, transform_indices = @transform_0, window_bounds = array<i64: 2048, 3>}, {transform_indices = @transform_1, window_bounds = array<i64: 3, 128>}, {transform_indices = @transform_2, window_bounds = array<i64: 1, 128>}, {transform_indices = @transform_3, window_bounds = array<i64: 2048, 128>}]} {
    %c0 = arith.constant 0 : index
    %c0_0 = arith.constant 0 : index
    %0 = vector.load %arg1[%c0, %c0_0] : memref<2048x3xf32, #tpu.memory_space<vmem>>, vector<2048x3xf32>
    %c0_1 = arith.constant 0 : index
    %c0_2 = arith.constant 0 : index
    %1 = vector.load %arg2[%c0_1, %c0_2] : memref<3x128xf32, #tpu.memory_space<vmem>>, vector<3x128xf32>
    %cst = arith.constant dense<0.000000e+00> : vector<2048x128xf32>
    %2 = tpu.matmul %0, %1, %cst {dimension_numbers = #tpu.dot_dimension_numbers<[1], [0], [0], [1], [0, 0, 1, 1], [], []>} : vector<2048x3xf32>, vector<3x128xf32>, vector<2048x128xf32> -> vector<2048x128xf32>
    %c0_3 = arith.constant 0 : index
    %c0_4 = arith.constant 0 : index
    %3 = vector.load %arg3[%c0_3, %c0_4] : memref<1x128xf32, #tpu.memory_space<vmem>>, vector<1x128xf32>
    %4 = vector.broadcast %3 : vector<1x128xf32> to vector<2048x128xf32>
    %5 = arith.addf %2, %4 : vector<2048x128xf32>
    %c0_5 = arith.constant 0 : index
    %c0_6 = arith.constant 0 : index
    %6 = vector.load %arg4[%c0_5, %c0_6] : memref<2048x128xf32, #tpu.memory_space<vmem>>, vector<2048x128xf32>
    tpu.vector_store %arg4[%c0_5, %c0_6], %5 {strides = array<i32>} : memref<2048x128xf32, #tpu.memory_space<vmem>>, vector<2048x128xf32>,
    return
  }
  func.func @transform_0(%arg0: i32) -> (i32, i32) {
    %c0_i32 = arith.constant 0 : i32
    %c0_i32_0 = arith.constant 0 : i32
    %c0_i32_1 = arith.constant 0 : i32
    return %c0_i32, %c0_i32_0 : i32, i32
  }
  func.func @transform_1(%arg0: i32) -> (i32, i32) {
    %c0_i32 = arith.constant 0 : i32
    %c0_i32_0 = arith.constant 0 : i32
    return %c0_i32, %arg0 : i32, i32
  }
  func.func @transform_2(%arg0: i32) -> (i32, i32) {
    %c0_i32 = arith.constant 0 : i32
    %c0_i32_0 = arith.constant 0 : i32
    return %c0_i32, %arg0 : i32, i32
  }
  func.func @transform_3(%arg0: i32) -> (i32, i32) {
    %c0_i32 = arith.constant 0 : i32
    %c0_i32_0 = arith.constant 0 : i32
    return %c0_i32, %arg0 : i32, i32
  }
}

</mosaic_0001>

<bundles_post_ra>
// kernel: linear.1
= control target key start
LH: loop header
LB: loop body
LE: loop exit
PB: predicated region body
PF: predicated region fallthrough
CT: control target
= control target key end

     0   :  { %vm1048_vm0 = vcmask 1042432   ;;  %vm279_vm1 = vcmask 23552   ;;  %s4917_s0 = inlined_call_operand.vmem [shape: f32[2048,3], index: 0, kind: input, shape index: {}]   ;;  %s4918_s1 = inlined_call_operand.vmem [shape: f32[3,128], index: 1, kind: input, shape index: {}]   ;;  %s4919_s2 = inlined_call_operand.vmem [shape: f32[1,128], index: 2, kind: input, shape index: {}]   ;;  %s4920_s3 = inlined_call_operand.hbm [shape: f32[2048,128], index: 3, kind: output, shape index: {}]  }
   0x1   :  { %v271_v0 = vld [vmem:[%s4918_s1] sm:$0x7]  ;;  %v16_v3 = vld [vmem:[%s4917_s0 + $0x8] sm:$0xff]  ;;  %v17_v5 = vld [vmem:[%s4917_s0 + $0x10] sm:$0xff] }
   0x2   :  { %v15_v1 = vld [vmem:[%s4917_s0] sm:$0xff]  ;;  %3184 = vmatprep.subr.msk.mxu0 %vm1048_vm0, %v271_v0  ;;  %3570 = vmatprep.subr.msk.mxu1 %vm1048_vm0, %v271_v0  ;;  %v144_v4 = vld [vmem:[%s4917_s0 + $0x408] sm:$0xff]  ;;  %v145_v6 = vld [vmem:[%s4917_s0 + $0x410] sm:$0xff] }
   0x3   :  { %v143_v2 = vld [vmem:[%s4917_s0 + $0x400] sm:$0xff]  ;;  %3185 = vmatpush3.msk.msra.mxu0 %vm1048_vm0, %v271_v0  ;;  %3571 = vmatpush3.msk.msra.mxu1 %vm1048_vm0, %v271_v0  ;;  %v18_v7 = vld [vmem:[%s4917_s0 + $0x18] sm:$0xff]  ;;  %v20_v11 = vld [vmem:[%s4917_s0 + $0x28] sm:$0xff] }
   0x4   :  { %3186 = vmatprep.mubr.msk.f32.mxu0 %vm279_vm1, %v15_v1  ;;  %3378 = vmatprep.mubr.msk.f32.mxu1 %vm279_vm1, %v143_v2  ;;  %v146_v8 = vld [vmem:[%s4917_s0 + $0x418] sm:$0xff]  ;;  %v19_v9 = vld [vmem:[%s4917_s0 + $0x20] sm:$0xff]  ;;  %v148_v12 = vld [vmem:[%s4917_s0 + $0x428] sm:$0xff] }
   0x5   :  { %3187 = vmatmul.mubr.msk.f32.vlgmr.msra.gmra.mxu0 %vm279_vm1, %v16_v3  ;;  %3379 = vmatmul.mubr.msk.f32.vlgmr.msra.gmra.mxu1 %vm279_vm1, %v144_v4  ;;  %v147_v10 = vld [vmem:[%s4917_s0 + $0x420] sm:$0xff]  ;;  %v21_v13 = vld [vmem:[%s4917_s0 + $0x30] sm:$0xff]  ;;  %v22_v15 = vld [vmem:[%s4917_s0 + $0x38] sm:$0xff] }
   0x6   :  { %3189 = vmatprep.mubr.msk.f32.mxu0 %vm279_vm1, %v17_v5  ;;  %3381 = vmatprep.mubr.msk.f32.mxu1 %vm279_vm1, %v145_v6  ;;  %v149_v14 = vld [vmem:[%s4917_s0 + $0x430] sm:$0xff]  ;;  %v150_v16 = vld [vmem:[%s4917_s0 + $0x438] sm:$0xff]  ;;  %v23_v17 = vld [vmem:[%s4917_s0 + $0x40] sm:$0xff] }
   0x7   :  { %v151_v18 = vld [vmem:[%s4917_s0 + $0x440] sm:$0xff]  ;;  %v24_v19 = vld [vmem:[%s4917_s0 + $0x48] sm:$0xff]  ;;  %v25_v21 = vld [vmem:[%s4917_s0 + $0x50] sm:$0xff] }
   0x8   :  { %v152_v20 = vld [vmem:[%s4917_s0 + $0x448] sm:$0xff]  ;;  %v153_v22 = vld [vmem:[%s4917_s0 + $0x450] sm:$0xff]  ;;  %v26_v23 = vld [vmem:[%s4917_s0 + $0x58] sm:$0xff] }
   0x9   :  { %3190 = vmatmul.mubr.msk.f32.gmra.mxu0 %vm279_vm1, %v18_v7  ;;  %3382 = vmatmul.mubr.msk.f32.gmra.mxu1 %vm279_vm1, %v146_v8  ;;  %v154_v24 = vld [vmem:[%s4917_s0 + $0x458] sm:$0xff]  ;;  %v27_v25 = vld [vmem:[%s4917_s0 + $0x60] sm:$0xff]  ;;  %v28_v27 = vld [vmem:[%s4917_s0 + $0x68] sm:$0xff] }
   0xa   :  { %3192 = vmatprep.mubr.msk.f32.mxu0 %vm279_vm1, %v19_v9  ;;  %3384 = vmatprep.mubr.msk.f32.mxu1 %vm279_vm1, %v147_v10  ;;  %v155_v26 = vld [vmem:[%s4917_s0 + $0x460] sm:$0xff]  ;;  %v156_v28 = vld [vmem:[%s4917_s0 + $0x468] sm:$0xff]  ;;  %v29_v29 = vld [vmem:[%s4917_s0 + $0x70] sm:$0xff] }
   0xb   :  { %v157_v30 = vld [vmem:[%s4917_s0 + $0x470] sm:$0xff]  ;;  %v30_v31 = vld [vmem:[%s4917_s0 + $0x78] sm:$0xff]  ;;  %v31_v33 = vld [vmem:[%s4917_s0 + $0x80] sm:$0xff] }
   0xc   :  { %v158_v32 = vld [vmem:[%s4917_s0 + $0x478] sm:$0xff]  ;;  %v159_v34 = vld [vmem:[%s4917_s0 + $0x480] sm:$0xff]  ;;  %v32_v35 = vld [vmem:[%s4917_s0 + $0x88] sm:$0xff] }
   0xd   :  { %3193 = vmatmul.mubr.msk.f32.gmra.mxu0 %vm279_vm1, %v20_v11  ;;  %3385 = vmatmul.mubr.msk.f32.gmra.mxu1 %vm279_vm1, %v148_v12  ;;  %v160_v36 = vld [vmem:[%s4917_s0 + $0x488] sm:$0xff]  ;;  %v33_v37 = vld [vmem:[%s4917_s0 + $0x90] sm:$0xff]  ;;  %v34_v39 = vld [vmem:[%s4917_s0 + $0x98] sm:$0xff] }
   0xe   :  { %3195 = vmatprep.mubr.msk.f32.mxu0 %vm279_vm1, %v21_v13  ;;  %3387 = vmatprep.mubr.msk.f32.mxu1 %vm279_vm1, %v149_v14  ;;  %v161_v38 = vld [vmem:[%s4917_s0 + $0x490] sm:$0xff]  ;;  %v162_v40 = vld [vmem:[%s4917_s0 + $0x498] sm:$0xff]  ;;  %v35_v41 = vld [vmem:[%s4917_s0 + $0xa0] sm:$0xff] }
   0xf   :  { %v163_v42 = vld [vmem:[%s4917_s0 + $0x4a0] sm:$0xff]  ;;  %v36_v43 = vld [vmem:[%s4917_s0 + $0xa8] sm:$0xff]  ;;  %v37_v45 = vld [vmem:[%s4917_s0 + $0xb0] sm:$0xff] }
  0x10   :  { %v164_v44 = vld [vmem:[%s4917_s0 + $0x4a8] sm:$0xff]  ;;  %v165_v46 = vld [vmem:[%s4917_s0 + $0x4b0] sm:$0xff]  ;;  %v38_v47 = vld [vmem:[%s4917_s0 + $0xb8] sm:$0xff] }
  0x11   :  { %3196 = vmatmul.mubr.msk.f32.gmra.mxu0 %vm279_vm1, %v22_v15  ;;  %3388 = vmatmul.mubr.msk.f32.gmra.mxu1 %vm279_vm1, %v150_v16  ;;  %v166_v48 = vld [vmem:[%s4917_s0 + $0x4b8] sm:$0xff]  ;;  %v39_v49 = vld [vmem:[%s4917_s0 + $0xc0] sm:$0xff]  ;;  %v40_v51 = vld [vmem:[%s4917_s0 + $0xc8] sm:$0xff] }
  0x12   :  { %3198 = vmatprep.mubr.msk.f32.mxu0 %vm279_vm1, %v23_v17  ;;  %3390 = vmatprep.mubr.msk.f32.mxu1 %vm279_vm1, %v151_v18  ;;  %v167_v50 = vld [vmem:[%s4917_s0 + $0x4c0] sm:$0xff]  ;;  %v168_v52 = vld [vmem:[%s4917_s0 + $0x4c8] sm:$0xff]  ;;  %v41_v53 = vld [vmem:[%s4917_s0 + $0xd0] sm:$0xff] }
  0x13   :  { %v169_v54 = vld [vmem:[%s4917_s0 + $0x4d0] sm:$0xff]  ;;  %v42_v55 = vld [vmem:[%s4917_s0 + $0xd8] sm:$0xff]  ;;  %v43_v57 = vld [vmem:[%s4917_s0 + $0xe0] sm:$0xff] }
  0x14   :  { %v170_v56 = vld [vmem:[%s4917_s0 + $0x4d8] sm:$0xff]  ;;  %v171_v58 = vld [vmem:[%s4917_s0 + $0x4e0] sm:$0xff]  ;;  %v44_v59 = vld [vmem:[%s4917_s0 + $0xe8] sm:$0xff] }
  0x15   :  { %3199 = vmatmul.mubr.msk.f32.gmra.mxu0 %vm279_vm1, %v24_v19  ;;  %3391 = vmatmul.mubr.msk.f32.gmra.mxu1 %vm279_vm1, %v152_v20  ;;  %v172_v60 = vld [vmem:[%s4917_s0 + $0x4e8] sm:$0xff]  ;;  %v45_v61 = vld [vmem:[%s4917_s0 + $0xf0] sm:$0xff]  ;;  %v46_v63 = vld [vmem:[%s4917_s0 + $0xf8] sm:$0xff] }
  0x16   :  { %3201 = vmatprep.mubr.msk.f32.mxu0 %vm279_vm1, %v25_v21  ;;  %3393 = vmatprep.mubr.msk.f32.mxu1 %vm279_vm1, %v153_v22  ;;  %v173_v62 = vld [vmem:[%s4917_s0 + $0x4f0] sm:$0xff]  ;;  %v174_v0 = vld [vmem:[%s4917_s0 + $0x4f8] sm:$0xff]  ;;  %v47_v1 = vld [vmem:[%s4917_s0 + $0x100] sm:$0xff] }
  0x17   :  { %v175_v2 = vld [vmem:[%s4917_s0 + $0x500] sm:$0xff] }
  0x19   :  { %3202 = vmatmul.mubr.msk.f32.gmra.mxu0 %vm279_vm1, %v26_v23  ;;  %3394 = vmatmul.mubr.msk.f32.gmra.mxu1 %vm279_vm1, %v154_v24 }
  0x1a   :  { %3204 = vmatprep.mubr.msk.f32.mxu0 %vm279_vm1, %v27_v25  ;;  %3396 = vmatprep.mubr.msk.f32.mxu1 %vm279_vm1, %v155_v26 }
  0x1d   :  { %3205 = vmatmul.mubr.msk.f32.gmra.mxu0 %vm279_vm1, %v28_v27  ;;  %3397 = vmatmul.mubr.msk.f32.gmra.mxu1 %vm279_vm1, %v156_v28 }
  0x1e   :  { %3207 = vmatprep.mubr.msk.f32.mxu0 %vm279_vm1, %v29_v29  ;;  %3399 = vmatprep.mubr.msk.f32.mxu1 %vm279_vm1, %v157_v30 }
  0x21   :  { %3208 = vmatmul.mubr.msk.f32.gmra.mxu0 %vm279_vm1, %v30_v31  ;;  %3400 = vmatmul.mubr.msk.f32.gmra.mxu1 %vm279_vm1, %v158_v32 }
  0x22   :  { %3210 = vmatprep.mubr.msk.f32.mxu0 %vm279_vm1, %v31_v33  ;;  %3402 = vmatprep.mubr.msk.f32.mxu1 %vm279_vm1, %v159_v34 }
  0x25   :  { %3211 = vmatmul.mubr.msk.f32.gmra.mxu0 %vm279_vm1, %v32_v35  ;;  %3403 = vmatmul.mubr.msk.f32.gmra.mxu1 %vm279_vm1, %v160_v36 }
  0x26   :  { %3213 = vmatprep.mubr.msk.f32.mxu0 %vm279_vm1, %v33_v37  ;;  %3405 = vmatprep.mubr.msk.f32.mxu1 %vm279_vm1, %v161_v38 }
  0x29   :  { %3214 = vmatmul.mubr.msk.f32.gmra.mxu0 %vm279_vm1, %v34_v39  ;;  %3406 = vmatmul.mubr.msk.f32.gmra.mxu1 %vm279_vm1, %v162_v40 }
  0x2a   :  { %3216 = vmatprep.mubr.msk.f32.mxu0 %vm279_vm1, %v35_v41  ;;  %3408 = vmatprep.mubr.msk.f32.mxu1 %vm279_vm1, %v163_v42 }
  0x2d   :  { %3217 = vmatmul.mubr.msk.f32.gmra.mxu0 %vm279_vm1, %v36_v43  ;;  %3409 = vmatmul.mubr.msk.f32.gmra.mxu1 %vm279_vm1, %v164_v44 }
  0x2e   :  { %3219 = vmatprep.mubr.msk.f32.mxu0 %vm279_vm1, %v37_v45  ;;  %3411 = vmatprep.mubr.msk.f32.mxu1 %vm279_vm1, %v165_v46 }
  0x31   :  { %3220 = vmatmul.mubr.msk.f32.gmra.mxu0 %vm279_vm1, %v38_v47  ;;  %3412 = vmatmul.mubr.msk.f32.gmra.mxu1 %vm279_vm1, %v166_v48 }
  0x32   :  { %3222 = vmatprep.mubr.msk.f32.mxu0 %vm279_vm1, %v39_v49  ;;  %3414 = vmatprep.mubr.msk.f32.mxu1 %vm279_vm1, %v167_v50 }
  0x35   :  { %3223 = vmatmul.mubr.msk.f32.gmra.mxu0 %vm279_vm1, %v40_v51  ;;  %3415 = vmatmul.mubr.msk.f32.gmra.mxu1 %vm279_vm1, %v168_v52 }
  0x36   :  { %3225 = vmatprep.mubr.msk.f32.mxu0 %vm279_vm1, %v41_v53  ;;  %3417 = vmatprep.mubr.msk.f32.mxu1 %vm279_vm1, %v169_v54 }
  0x39   :  { %3226 = vmatmul.mubr.msk.f32.gmra.mxu0 %vm279_vm1, %v42_v55  ;;  %3418 = vmatmul.mubr.msk.f32.gmra.mxu1 %vm279_vm1, %v170_v56 }
  0x3a   :  { %3228 = vmatprep.mubr.msk.f32.mxu0 %vm279_vm1, %v43_v57  ;;  %3420 = vmatprep.mubr.msk.f32.mxu1 %vm279_vm1, %v171_v58 }
  0x3d   :  { %3229 = vmatmul.mubr.msk.f32.gmra.mxu0 %vm279_vm1, %v44_v59  ;;  %3421 = vmatmul.mubr.msk.f32.gmra.mxu1 %vm279_vm1, %v172_v60 }
  0x3e   :  { %3231 = vmatprep.mubr.msk.f32.mxu0 %vm279_vm1, %v45_v61  ;;  %3423 = vmatprep.mubr.msk.f32.mxu1 %vm279_vm1, %v173_v62 }
  0x41   :  { %3232 = vmatmul.mubr.msk.f32.gmra.mxu0 %vm279_vm1, %v46_v63  ;;  %3424 = vmatmul.mubr.msk.f32.gmra.mxu1 %vm279_vm1, %v174_v0 }
  0x42   :  { %8 = vsyncpa [#allocation3], 0  ;;  %3234 = vmatprep.mubr.msk.f32.mxu0 %vm279_vm1, %v47_v1  ;;  %3426 = vmatprep.mubr.msk.f32.mxu1 %vm279_vm1, %v175_v2  ;;  %v48_v3 = vld [vmem:[%s4917_s0 + $0x108] sm:$0xff]  ;;  %v49_v5 = vld [vmem:[%s4917_s0 + $0x110] sm:$0xff] }
  0x43   :  { %v176_v4 = vld [vmem:[%s4917_s0 + $0x508] sm:$0xff]  ;;  %v177_v6 = vld [vmem:[%s4917_s0 + $0x510] sm:$0xff]  ;;  %v50_v7 = vld [vmem:[%s4917_s0 + $0x118] sm:$0xff] }
  0x44   :  { %v178_v8 = vld [vmem:[%s4917_s0 + $0x518] sm:$0xff]  ;;  %v51_v9 = vld [vmem:[%s4917_s0 + $0x120] sm:$0xff]  ;;  %v52_v11 = vld [vmem:[%s4917_s0 + $0x128] sm:$0xff] }
  0x45   :  { %3235 = vmatmul.mubr.msk.f32.gmra.mxu0 %vm279_vm1, %v48_v3  ;;  %3427 = vmatmul.mubr.msk.f32.gmra.mxu1 %vm279_vm1, %v176_v4  ;;  %v179_v10 = vld [vmem:[%s4917_s0 + $0x520] sm:$0xff]  ;;  %v180_v12 = vld [vmem:[%s4917_s0 + $0x528] sm:$0xff]  ;;  %v53_v13 = vld [vmem:[%s4917_s0 + $0x130] sm:$0xff] }
  0x46   :  { %3237 = vmatprep.mubr.msk.f32.mxu0 %vm279_vm1, %v49_v5  ;;  %3429 = vmatprep.mubr.msk.f32.mxu1 %vm279_vm1, %v177_v6  ;;  %v181_v14 = vld [vmem:[%s4917_s0 + $0x530] sm:$0xff]  ;;  %v54_v15 = vld [vmem:[%s4917_s0 + $0x138] sm:$0xff]  ;;  %v55_v17 = vld [vmem:[%s4917_s0 + $0x140] sm:$0xff] }
  0x47   :  { %v182_v16 = vld [vmem:[%s4917_s0 + $0x538] sm:$0xff]  ;;  %v183_v18 = vld [vmem:[%s4917_s0 + $0x540] sm:$0xff]  ;;  %v56_v19 = vld [vmem:[%s4917_s0 + $0x148] sm:$0xff] }
  0x48   :  { %v184_v20 = vld [vmem:[%s4917_s0 + $0x548] sm:$0xff]  ;;  %v57_v21 = vld [vmem:[%s4917_s0 + $0x150] sm:$0xff]  ;;  %v58_v23 = vld [vmem:[%s4917_s0 + $0x158] sm:$0xff] }
  0x49   :  { %3238 = vmatmul.mubr.msk.f32.gmra.mxu0 %vm279_vm1, %v50_v7  ;;  %3430 = vmatmul.mubr.msk.f32.gmra.mxu1 %vm279_vm1, %v178_v8  ;;  %v185_v22 = vld [vmem:[%s4917_s0 + $0x550] sm:$0xff]  ;;  %v186_v24 = vld [vmem:[%s4917_s0 + $0x558] sm:$0xff]  ;;  %v59_v25 = vld [vmem:[%s4917_s0 + $0x160] sm:$0xff] }
  0x4a   :  { %3240 = vmatprep.mubr.msk.f32.mxu0 %vm279_vm1, %v51_v9  ;;  %3432 = vmatprep.mubr.msk.f32.mxu1 %vm279_vm1, %v179_v10  ;;  %v187_v26 = vld [vmem:[%s4917_s0 + $0x560] sm:$0xff]  ;;  %v60_v27 = vld [vmem:[%s4917_s0 + $0x168] sm:$0xff]  ;;  %v61_v29 = vld [vmem:[%s4917_s0 + $0x170] sm:$0xff] }
  0x4b   :  { %v188_v28 = vld [vmem:[%s4917_s0 + $0x568] sm:$0xff]  ;;  %v189_v30 = vld [vmem:[%s4917_s0 + $0x570] sm:$0xff]  ;;  %v62_v31 = vld [vmem:[%s4917_s0 + $0x178] sm:$0xff] }
  0x4c   :  { %v190_v32 = vld [vmem:[%s4917_s0 + $0x578] sm:$0xff]  ;;  %v63_v33 = vld [vmem:[%s4917_s0 + $0x180] sm:$0xff]  ;;  %v64_v35 = vld [vmem:[%s4917_s0 + $0x188] sm:$0xff] }
  0x4d   :  { %3241 = vmatmul.mubr.msk.f32.gmra.mxu0 %vm279_vm1, %v52_v11  ;;  %3433 = vmatmul.mubr.msk.f32.gmra.mxu1 %vm279_vm1, %v180_v12  ;;  %v191_v34 = vld [vmem:[%s4917_s0 + $0x580] sm:$0xff]  ;;  %v192_v36 = vld [vmem:[%s4917_s0 + $0x588] sm:$0xff]  ;;  %v65_v37 = vld [vmem:[%s4917_s0 + $0x190] sm:$0xff] }
  0x4e   :  { %3243 = vmatprep.mubr.msk.f32.mxu0 %vm279_vm1, %v53_v13  ;;  %3435 = vmatprep.mubr.msk.f32.mxu1 %vm279_vm1, %v181_v14  ;;  %v193_v38 = vld [vmem:[%s4917_s0 + $0x590] sm:$0xff]  ;;  %v66_v39 = vld [vmem:[%s4917_s0 + $0x198] sm:$0xff]  ;;  %v67_v41 = vld [vmem:[%s4917_s0 + $0x1a0] sm:$0xff] }
  0x4f   :  { %v194_v40 = vld [vmem:[%s4917_s0 + $0x598] sm:$0xff]  ;;  %v195_v42 = vld [vmem:[%s4917_s0 + $0x5a0] sm:$0xff]  ;;  %v68_v43 = vld [vmem:[%s4917_s0 + $0x1a8] sm:$0xff] }
  0x50   :  { %v196_v44 = vld [vmem:[%s4917_s0 + $0x5a8] sm:$0xff]  ;;  %v69_v45 = vld [vmem:[%s4917_s0 + $0x1b0] sm:$0xff]  ;;  %v70_v47 = vld [vmem:[%s4917_s0 + $0x1b8] sm:$0xff] }
  0x51   :  { %3244 = vmatmul.mubr.msk.f32.gmra.mxu0 %vm279_vm1, %v54_v15  ;;  %3436 = vmatmul.mubr.msk.f32.gmra.mxu1 %vm279_vm1, %v182_v16  ;;  %v197_v46 = vld [vmem:[%s4917_s0 + $0x5b0] sm:$0xff]  ;;  %v198_v48 = vld [vmem:[%s4917_s0 + $0x5b8] sm:$0xff]  ;;  %v71_v49 = vld [vmem:[%s4917_s0 + $0x1c0] sm:$0xff] }
  0x52   :  { %3246 = vmatprep.mubr.msk.f32.mxu0 %vm279_vm1, %v55_v17  ;;  %3438 = vmatprep.mubr.msk.f32.mxu1 %vm279_vm1, %v183_v18  ;;  %v199_v50 = vld [vmem:[%s4917_s0 + $0x5c0] sm:$0xff]  ;;  %v72_v51 = vld [vmem:[%s4917_s0 + $0x1c8] sm:$0xff]  ;;  %v73_v53 = vld [vmem:[%s4917_s0 + $0x1d0] sm:$0xff] }
  0x53   :  { %v200_v52 = vld [vmem:[%s4917_s0 + $0x5c8] sm:$0xff]  ;;  %v201_v54 = vld [vmem:[%s4917_s0 + $0x5d0] sm:$0xff]  ;;  %v74_v55 = vld [vmem:[%s4917_s0 + $0x1d8] sm:$0xff] }
  0x54   :  { %v202_v56 = vld [vmem:[%s4917_s0 + $0x5d8] sm:$0xff]  ;;  %v75_v57 = vld [vmem:[%s4917_s0 + $0x1e0] sm:$0xff]  ;;  %v76_v59 = vld [vmem:[%s4917_s0 + $0x1e8] sm:$0xff] }
  0x55   :  { %3247 = vmatmul.mubr.msk.f32.gmra.mxu0 %vm279_vm1, %v56_v19  ;;  %3439 = vmatmul.mubr.msk.f32.gmra.mxu1 %vm279_vm1, %v184_v20  ;;  %v203_v58 = vld [vmem:[%s4917_s0 + $0x5e0] sm:$0xff]  ;;  %v204_v60 = vld [vmem:[%s4917_s0 + $0x5e8] sm:$0xff]  ;;  %v77_v61 = vld [vmem:[%s4917_s0 + $0x1f0] sm:$0xff] }
  0x56   :  { %3249 = vmatprep.mubr.msk.f32.mxu0 %vm279_vm1, %v57_v21  ;;  %3441 = vmatprep.mubr.msk.f32.mxu1 %vm279_vm1, %v185_v22  ;;  %v205_v62 = vld [vmem:[%s4917_s0 + $0x5f0] sm:$0xff]  ;;  %v78_v63 = vld [vmem:[%s4917_s0 + $0x1f8] sm:$0xff]  ;;  %v79_v1 = vld [vmem:[%s4917_s0 + $0x200] sm:$0xff] }
  0x57   :  { %v206_v0 = vld [vmem:[%s4917_s0 + $0x5f8] sm:$0xff]  ;;  %v207_v2 = vld [vmem:[%s4917_s0 + $0x600] sm:$0xff]  ;;  %v80_v3 = vld [vmem:[%s4917_s0 + $0x208] sm:$0xff] }
  0x58   :  { %v208_v4 = vld [vmem:[%s4917_s0 + $0x608] sm:$0xff]  ;;  %v81_v5 = vld [vmem:[%s4917_s0 + $0x210] sm:$0xff]  ;;  %v82_v7 = vld [vmem:[%s4917_s0 + $0x218] sm:$0xff] }
  0x59   :  { %3250 = vmatmul.mubr.msk.f32.gmra.mxu0 %vm279_vm1, %v58_v23  ;;  %3442 = vmatmul.mubr.msk.f32.gmra.mxu1 %vm279_vm1, %v186_v24  ;;  %v209_v6 = vld [vmem:[%s4917_s0 + $0x610] sm:$0xff]  ;;  %v210_v8 = vld [vmem:[%s4917_s0 + $0x618] sm:$0xff]  ;;  %v83_v9 = vld [vmem:[%s4917_s0 + $0x220] sm:$0xff] }
  0x5a   :  { %3252 = vmatprep.mubr.msk.f32.mxu0 %vm279_vm1, %v59_v25  ;;  %3444 = vmatprep.mubr.msk.f32.mxu1 %vm279_vm1, %v187_v26  ;;  %v211_v10 = vld [vmem:[%s4917_s0 + $0x620] sm:$0xff]  ;;  %v84_v11 = vld [vmem:[%s4917_s0 + $0x228] sm:$0xff]  ;;  %v85_v13 = vld [vmem:[%s4917_s0 + $0x230] sm:$0xff] }
  0x5b   :  { %v212_v12 = vld [vmem:[%s4917_s0 + $0x628] sm:$0xff]  ;;  %v213_v14 = vld [vmem:[%s4917_s0 + $0x630] sm:$0xff]  ;;  %v86_v15 = vld [vmem:[%s4917_s0 + $0x238] sm:$0xff] }
  0x5c   :  { %v214_v16 = vld [vmem:[%s4917_s0 + $0x638] sm:$0xff]  ;;  %v87_v17 = vld [vmem:[%s4917_s0 + $0x240] sm:$0xff]  ;;  %v88_v19 = vld [vmem:[%s4917_s0 + $0x248] sm:$0xff] }
  0x5d   :  { %3253 = vmatmul.mubr.msk.f32.gmra.mxu0 %vm279_vm1, %v60_v27  ;;  %3445 = vmatmul.mubr.msk.f32.gmra.mxu1 %vm279_vm1, %v188_v28  ;;  %v215_v18 = vld [vmem:[%s4917_s0 + $0x640] sm:$0xff]  ;;  %v216_v20 = vld [vmem:[%s4917_s0 + $0x648] sm:$0xff]  ;;  %v89_v21 = vld [vmem:[%s4917_s0 + $0x250] sm:$0xff] }
  0x5e   :  { %3255 = vmatprep.mubr.msk.f32.mxu0 %vm279_vm1, %v61_v29  ;;  %3447 = vmatprep.mubr.msk.f32.mxu1 %vm279_vm1, %v189_v30  ;;  %v217_v22 = vld [vmem:[%s4917_s0 + $0x650] sm:$0xff]  ;;  %v90_v23 = vld [vmem:[%s4917_s0 + $0x258] sm:$0xff]  ;;  %v91_v25 = vld [vmem:[%s4917_s0 + $0x260] sm:$0xff] }
  0x5f   :  { %v218_v24 = vld [vmem:[%s4917_s0 + $0x658] sm:$0xff]  ;;  %v219_v26 = vld [vmem:[%s4917_s0 + $0x660] sm:$0xff]  ;;  %v92_v27 = vld [vmem:[%s4917_s0 + $0x268] sm:$0xff] }
  0x60   :  { %v220_v28 = vld [vmem:[%s4917_s0 + $0x668] sm:$0xff]  ;;  %v93_v29 = vld [vmem:[%s4917_s0 + $0x270] sm:$0xff] }
  0x61   :  { %3256 = vmatmul.mubr.msk.f32.gmra.mxu0 %vm279_vm1, %v62_v31  ;;  %3448 = vmatmul.mubr.msk.f32.gmra.mxu1 %vm279_vm1, %v190_v32  ;;  %v221_v30 = vld [vmem:[%s4917_s0 + $0x670] sm:$0xff]  ;;  %v94_v31 = vld [vmem:[%s4917_s0 + $0x278] sm:$0xff] }
  0x62   :  { %3258 = vmatprep.mubr.msk.f32.mxu0 %vm279_vm1, %v63_v33  ;;  %3450 = vmatprep.mubr.msk.f32.mxu1 %vm279_vm1, %v191_v34  ;;  %v222_v32 = vld [vmem:[%s4917_s0 + $0x678] sm:$0xff]  ;;  %v95_v33 = vld [vmem:[%s4917_s0 + $0x280] sm:$0xff] }
  0x63   :  { %v223_v34 = vld [vmem:[%s4917_s0 + $0x680] sm:$0xff] }
  0x65   :  { %3259 = vmatmul.mubr.msk.f32.gmra.mxu0 %vm279_vm1, %v64_v35  ;;  %3451 = vmatmul.mubr.msk.f32.gmra.mxu1 %vm279_vm1, %v192_v36  ;;  %v96_v35 = vld [vmem:[%s4917_s0 + $0x288] sm:$0xff] }
  0x66   :  { %3261 = vmatprep.mubr.msk.f32.mxu0 %vm279_vm1, %v65_v37  ;;  %3453 = vmatprep.mubr.msk.f32.mxu1 %vm279_vm1, %v193_v38  ;;  %v224_v36 = vld [vmem:[%s4917_s0 + $0x688] sm:$0xff]  ;;  %v97_v37 = vld [vmem:[%s4917_s0 + $0x290] sm:$0xff] }
  0x67   :  { %v225_v38 = vld [vmem:[%s4917_s0 + $0x690] sm:$0xff] }
  0x69   :  { %3262 = vmatmul.mubr.msk.f32.gmra.mxu0 %vm279_vm1, %v66_v39  ;;  %3454 = vmatmul.mubr.msk.f32.gmra.mxu1 %vm279_vm1, %v194_v40  ;;  %v98_v39 = vld [vmem:[%s4917_s0 + $0x298] sm:$0xff] }
  0x6a   :  { %3264 = vmatprep.mubr.msk.f32.mxu0 %vm279_vm1, %v67_v41  ;;  %3456 = vmatprep.mubr.msk.f32.mxu1 %vm279_vm1, %v195_v42  ;;  %v226_v40 = vld [vmem:[%s4917_s0 + $0x698] sm:$0xff]  ;;  %v99_v41 = vld [vmem:[%s4917_s0 + $0x2a0] sm:$0xff] }
  0x6b   :  { %v227_v42 = vld [vmem:[%s4917_s0 + $0x6a0] sm:$0xff] }
  0x6d   :  { %3265 = vmatmul.mubr.msk.f32.gmra.mxu0 %vm279_vm1, %v68_v43  ;;  %3457 = vmatmul.mubr.msk.f32.gmra.mxu1 %vm279_vm1, %v196_v44  ;;  %v100_v43 = vld [vmem:[%s4917_s0 + $0x2a8] sm:$0xff] }
  0x6e   :  { %3267 = vmatprep.mubr.msk.f32.mxu0 %vm279_vm1, %v69_v45  ;;  %3459 = vmatprep.mubr.msk.f32.mxu1 %vm279_vm1, %v197_v46  ;;  %v228_v44 = vld [vmem:[%s4917_s0 + $0x6a8] sm:$0xff]  ;;  %v101_v45 = vld [vmem:[%s4917_s0 + $0x2b0] sm:$0xff] }
  0x6f   :  { %v229_v46 = vld [vmem:[%s4917_s0 + $0x6b0] sm:$0xff] }
  0x71   :  { %3268 = vmatmul.mubr.msk.f32.gmra.mxu0 %vm279_vm1, %v70_v47  ;;  %3460 = vmatmul.mubr.msk.f32.gmra.mxu1 %vm279_vm1, %v198_v48  ;;  %v102_v47 = vld [vmem:[%s4917_s0 + $0x2b8] sm:$0xff] }
  0x72   :  { %3270 = vmatprep.mubr.msk.f32.mxu0 %vm279_vm1, %v71_v49  ;;  %3462 = vmatprep.mubr.msk.f32.mxu1 %vm279_vm1, %v199_v50  ;;  %v230_v48 = vld [vmem:[%s4917_s0 + $0x6b8] sm:$0xff]  ;;  %v103_v49 = vld [vmem:[%s4917_s0 + $0x2c0] sm:$0xff] }
  0x73   :  { %v231_v50 = vld [vmem:[%s4917_s0 + $0x6c0] sm:$0xff] }
  0x75   :  { %3271 = vmatmul.mubr.msk.f32.gmra.mxu0 %vm279_vm1, %v72_v51  ;;  %3463 = vmatmul.mubr.msk.f32.gmra.mxu1 %vm279_vm1, %v200_v52  ;;  %v104_v51 = vld [vmem:[%s4917_s0 + $0x2c8] sm:$0xff] }
  0x76   :  { %3273 = vmatprep.mubr.msk.f32.mxu0 %vm279_vm1, %v73_v53  ;;  %3465 = vmatprep.mubr.msk.f32.mxu1 %vm279_vm1, %v201_v54  ;;  %v232_v52 = vld [vmem:[%s4917_s0 + $0x6c8] sm:$0xff]  ;;  %v105_v53 = vld [vmem:[%s4917_s0 + $0x2d0] sm:$0xff] }
  0x77   :  { %v233_v54 = vld [vmem:[%s4917_s0 + $0x6d0] sm:$0xff] }
  0x79   :  { %3274 = vmatmul.mubr.msk.f32.gmra.mxu0 %vm279_vm1, %v74_v55  ;;  %3466 = vmatmul.mubr.msk.f32.gmra.mxu1 %vm279_vm1, %v202_v56  ;;  %v106_v55 = vld [vmem:[%s4917_s0 + $0x2d8] sm:$0xff] }
  0x7a   :  { %3276 = vmatprep.mubr.msk.f32.mxu0 %vm279_vm1, %v75_v57  ;;  %3468 = vmatprep.mubr.msk.f32.mxu1 %vm279_vm1, %v203_v58  ;;  %v234_v56 = vld [vmem:[%s4917_s0 + $0x6d8] sm:$0xff]  ;;  %v107_v57 = vld [vmem:[%s4917_s0 + $0x2e0] sm:$0xff] }
  0x7b   :  { %v235_v58 = vld [vmem:[%s4917_s0 + $0x6e0] sm:$0xff] }
  0x7d   :  { %3277 = vmatmul.mubr.msk.f32.gmra.mxu0 %vm279_vm1, %v76_v59  ;;  %3469 = vmatmul.mubr.msk.f32.gmra.mxu1 %vm279_vm1, %v204_v60  ;;  %v108_v59 = vld [vmem:[%s4917_s0 + $0x2e8] sm:$0xff] }
  0x7e   :  { %3279 = vmatprep.mubr.msk.f32.mxu0 %vm279_vm1, %v77_v61  ;;  %3471 = vmatprep.mubr.msk.f32.mxu1 %vm279_vm1, %v205_v62  ;;  %v236_v60 = vld [vmem:[%s4917_s0 + $0x6e8] sm:$0xff]  ;;  %v109_v61 = vld [vmem:[%s4917_s0 + $0x2f0] sm:$0xff] }
  0x7f   :  { %v237_v62 = vld [vmem:[%s4917_s0 + $0x6f0] sm:$0xff] }
  0x81   :  { %3280 = vmatmul.mubr.msk.f32.gmra.mxu0 %vm279_vm1, %v78_v63  ;;  %3472 = vmatmul.mubr.msk.f32.gmra.mxu1 %vm279_vm1, %v206_v0  ;;  %v110_v63 = vld [vmem:[%s4917_s0 + $0x2f8] sm:$0xff] }
  0x82   :  { %3282 = vmatprep.mubr.msk.f32.mxu0 %vm279_vm1, %v79_v1  ;;  %3474 = vmatprep.mubr.msk.f32.mxu1 %vm279_vm1, %v207_v2  ;;  %v238_v0 = vld [vmem:[%s4917_s0 + $0x6f8] sm:$0xff]  ;;  %v111_v1 = vld [vmem:[%s4917_s0 + $0x300] sm:$0xff] }
  0x83   :  { %v239_v2 = vld [vmem:[%s4917_s0 + $0x700] sm:$0xff] }
  0x85   :  { %3283 = vmatmul.mubr.msk.f32.gmra.mxu0 %vm279_vm1, %v80_v3  ;;  %3475 = vmatmul.mubr.msk.f32.gmra.mxu1 %vm279_vm1, %v208_v4  ;;  %v112_v3 = vld [vmem:[%s4917_s0 + $0x308] sm:$0xff] }
  0x86   :  { %3285 = vmatprep.mubr.msk.f32.mxu0 %vm279_vm1, %v81_v5  ;;  %3477 = vmatprep.mubr.msk.f32.mxu1 %vm279_vm1, %v209_v6  ;;  %v240_v4 = vld [vmem:[%s4917_s0 + $0x708] sm:$0xff]  ;;  %v4409_v5 = vld [vmem:[%s4919_s2] ss:$0 sm:$0xff]  ;;  %v113_v6 = vld [vmem:[%s4917_s0 + $0x310] sm:$0xff] }
  0x89   :  { %3286 = vmatmul.mubr.msk.f32.gmra.mxu0 %vm279_vm1, %v82_v7  ;;  %3478 = vmatmul.mubr.msk.f32.gmra.mxu1 %vm279_vm1, %v210_v8  ;;  %v241_v7 = vld [vmem:[%s4917_s0 + $0x710] sm:$0xff] }
  0x8a   :  { %3288 = vmatprep.mubr.msk.f32.mxu0 %vm279_vm1, %v83_v9  ;;  %3480 = vmatprep.mubr.msk.f32.mxu1 %vm279_vm1, %v211_v10 }
  0x8d   :  { %3289 = vmatmul.mubr.msk.f32.gmra.mxu0 %vm279_vm1, %v84_v11  ;;  %3481 = vmatmul.mubr.msk.f32.gmra.mxu1 %vm279_vm1, %v212_v12  ;;  %v114_v12 = vld [vmem:[%s4917_s0 + $0x318] sm:$0xff] }
  0x8e   :  { %3291 = vmatprep.mubr.msk.f32.mxu0 %vm279_vm1, %v85_v13  ;;  %3483 = vmatprep.mubr.msk.f32.mxu1 %vm279_vm1, %v213_v14  ;;  %v242_v13 = vld [vmem:[%s4917_s0 + $0x718] sm:$0xff] }
  0x91   :  { %3292 = vmatmul.mubr.msk.f32.gmra.mxu0 %vm279_vm1, %v86_v15  ;;  %3484 = vmatmul.mubr.msk.f32.gmra.mxu1 %vm279_vm1, %v214_v16  ;;  %v115_v16 = vld [vmem:[%s4917_s0 + $0x320] sm:$0xff] }
  0x92   :  { %3294 = vmatprep.mubr.msk.f32.mxu0 %vm279_vm1, %v87_v17  ;;  %3486 = vmatprep.mubr.msk.f32.mxu1 %vm279_vm1, %v215_v18  ;;  %v243_v17 = vld [vmem:[%s4917_s0 + $0x720] sm:$0xff] }
  0x95   :  { %3295 = vmatmul.mubr.msk.f32.gmra.mxu0 %vm279_vm1, %v88_v19  ;;  %3487 = vmatmul.mubr.msk.f32.gmra.mxu1 %vm279_vm1, %v216_v20 }
  0x96   :  { %3297 = vmatprep.mubr.msk.f32.mxu0 %vm279_vm1, %v89_v21  ;;  %3489 = vmatprep.mubr.msk.f32.mxu1 %vm279_vm1, %v217_v22 }
  0x99   :  { %3298 = vmatmul.mubr.msk.f32.gmra.mxu0 %vm279_vm1, %v90_v23  ;;  %3490 = vmatmul.mubr.msk.f32.gmra.mxu1 %vm279_vm1, %v218_v24  ;;  %v116_v24 = vld [vmem:[%s4917_s0 + $0x328] sm:$0xff] }
  0x9a   :  { %3300 = vmatprep.mubr.msk.f32.mxu0 %vm279_vm1, %v91_v25  ;;  %3492 = vmatprep.mubr.msk.f32.mxu1 %vm279_vm1, %v219_v26  ;;  %v244_v25 = vld [vmem:[%s4917_s0 + $0x728] sm:$0xff] }
  0x9d   :  { %3301 = vmatmul.mubr.msk.f32.gmra.mxu0 %vm279_vm1, %v92_v27  ;;  %3493 = vmatmul.mubr.msk.f32.gmra.mxu1 %vm279_vm1, %v220_v28  ;;  %v117_v28 = vld [vmem:[%s4917_s0 + $0x330] sm:$0xff] }
  0x9e   :  { %3303 = vmatprep.mubr.msk.f32.mxu0 %vm279_vm1, %v93_v29  ;;  %3495 = vmatprep.mubr.msk.f32.mxu1 %vm279_vm1, %v221_v30  ;;  %v245_v29 = vld [vmem:[%s4917_s0 + $0x730] sm:$0xff] }
  0xa1   :  { %3304 = vmatmul.mubr.msk.f32.gmra.mxu0 %vm279_vm1, %v94_v31  ;;  %3496 = vmatmul.mubr.msk.f32.gmra.mxu1 %vm279_vm1, %v222_v32 }
  0xa2   :  { %3306 = vmatprep.mubr.msk.f32.mxu0 %vm279_vm1, %v95_v33  ;;  %3498 = vmatprep.mubr.msk.f32.mxu1 %vm279_vm1, %v223_v34 }
  0xa5   :  { %3307 = vmatmul.mubr.msk.f32.gmra.mxu0 %vm279_vm1, %v96_v35  ;;  %3499 = vmatmul.mubr.msk.f32.gmra.mxu1 %vm279_vm1, %v224_v36  ;;  %v118_v36 = vld [vmem:[%s4917_s0 + $0x338] sm:$0xff] }
  0xa6   :  { %3309 = vmatprep.mubr.msk.f32.mxu0 %vm279_vm1, %v97_v37  ;;  %3501 = vmatprep.mubr.msk.f32.mxu1 %vm279_vm1, %v225_v38  ;;  %v246_v37 = vld [vmem:[%s4917_s0 + $0x738] sm:$0xff] }
  0xa9   :  { %3310 = vmatmul.mubr.msk.f32.gmra.mxu0 %vm279_vm1, %v98_v39  ;;  %3502 = vmatmul.mubr.msk.f32.gmra.mxu1 %vm279_vm1, %v226_v40  ;;  %v119_v40 = vld [vmem:[%s4917_s0 + $0x340] sm:$0xff] }
  0xaa   :  { %3312 = vmatprep.mubr.msk.f32.mxu0 %vm279_vm1, %v99_v41  ;;  %3504 = vmatprep.mubr.msk.f32.mxu1 %vm279_vm1, %v227_v42  ;;  %v247_v41 = vld [vmem:[%s4917_s0 + $0x740] sm:$0xff] }
  0xad   :  { %3313 = vmatmul.mubr.msk.f32.gmra.mxu0 %vm279_vm1, %v100_v43  ;;  %3505 = vmatmul.mubr.msk.f32.gmra.mxu1 %vm279_vm1, %v228_v44 }
  0xae   :  { %3315 = vmatprep.mubr.msk.f32.mxu0 %vm279_vm1, %v101_v45  ;;  %3507 = vmatprep.mubr.msk.f32.mxu1 %vm279_vm1, %v229_v46 }
  0xb1   :  { %3316 = vmatmul.mubr.msk.f32.gmra.mxu0 %vm279_vm1, %v102_v47  ;;  %3508 = vmatmul.mubr.msk.f32.gmra.mxu1 %vm279_vm1, %v230_v48  ;;  %v120_v48 = vld [vmem:[%s4917_s0 + $0x348] sm:$0xff] }
  0xb2   :  { %3318 = vmatprep.mubr.msk.f32.mxu0 %vm279_vm1, %v103_v49  ;;  %3510 = vmatprep.mubr.msk.f32.mxu1 %vm279_vm1, %v231_v50  ;;  %v248_v49 = vld [vmem:[%s4917_s0 + $0x748] sm:$0xff] }
  0xb5   :  { %3319 = vmatmul.mubr.msk.f32.gmra.mxu0 %vm279_vm1, %v104_v51  ;;  %3511 = vmatmul.mubr.msk.f32.gmra.mxu1 %vm279_vm1, %v232_v52  ;;  %v121_v52 = vld [vmem:[%s4917_s0 + $0x350] sm:$0xff] }
  0xb6   :  { %3321 = vmatprep.mubr.msk.f32.mxu0 %vm279_vm1, %v105_v53  ;;  %3513 = vmatprep.mubr.msk.f32.mxu1 %vm279_vm1, %v233_v54  ;;  %v249_v53 = vld [vmem:[%s4917_s0 + $0x750] sm:$0xff] }
  0xb9   :  { %3322 = vmatmul.mubr.msk.f32.gmra.mxu0 %vm279_vm1, %v106_v55  ;;  %3514 = vmatmul.mubr.msk.f32.gmra.mxu1 %vm279_vm1, %v234_v56 }
  0xba   :  { %3324 = vmatprep.mubr.msk.f32.mxu0 %vm279_vm1, %v107_v57  ;;  %3516 = vmatprep.mubr.msk.f32.mxu1 %vm279_vm1, %v235_v58 }
  0xbd   :  { %3325 = vmatmul.mubr.msk.f32.gmra.mxu0 %vm279_vm1, %v108_v59  ;;  %3517 = vmatmul.mubr.msk.f32.gmra.mxu1 %vm279_vm1, %v236_v60  ;;  %v122_v60 = vld [vmem:[%s4917_s0 + $0x358] sm:$0xff] }
  0xbe   :  { %3327 = vmatprep.mubr.msk.f32.mxu0 %vm279_vm1, %v109_v61  ;;  %3519 = vmatprep.mubr.msk.f32.mxu1 %vm279_vm1, %v237_v62  ;;  %v250_v61 = vld [vmem:[%s4917_s0 + $0x758] sm:$0xff] }
  0xc1   :  { %3328 = vmatmul.mubr.msk.f32.gmra.mxu0 %vm279_vm1, %v110_v63  ;;  %3520 = vmatmul.mubr.msk.f32.gmra.mxu1 %vm279_vm1, %v238_v0  ;;  %v123_v0 = vld [vmem:[%s4917_s0 + $0x360] sm:$0xff] }
  0xc2   :  { %3330 = vmatprep.mubr.msk.f32.mxu0 %vm279_vm1, %v111_v1  ;;  %3522 = vmatprep.mubr.msk.f32.mxu1 %vm279_vm1, %v239_v2  ;;  %v251_v1 = vld [vmem:[%s4917_s0 + $0x760] sm:$0xff] }
  0xc5   :  { %v3188_v8 = vpop.f32.mrf.mxu0  ;;  %3331 = vmatmul.mubr.msk.f32.gmra.mxu0 %vm279_vm1, %v112_v3  ;;  %v3380_v9 = vpop.f32.mrf.mxu1  ;;  %3523 = vmatmul.mubr.msk.f32.gmra.mxu1 %vm279_vm1, %v240_v4 }
  0xc6   :  { %v1124_v10 = vadd.f32 %v3188_v8, %v4409_v5  ;;  %v1764_v11 = vadd.f32 %v3380_v9, %v4409_v5  ;;  %3333 = vmatprep.mubr.msk.f32.mxu0 %vm279_vm1, %v113_v6  ;;  %3525 = vmatprep.mubr.msk.f32.mxu1 %vm279_vm1, %v241_v7  ;;  %v124_v9 = vld [vmem:[%s4917_s0 + $0x368] sm:$0xff] }
  0xc7   :  { %v1118_v14 = vpop.f32.mrf.mxu0  ;;  %v1758_v15 = vpop.f32.mrf.mxu1 }
  0xc8   :  { %2398 = vst [vmem:[#allocation2 + $0x8] sm:$0xff] %v1124_v10  ;;  %2526 = vst [vmem:[#allocation2 + $0x408] sm:$0xff] %v1764_v11  ;;  %v1119_v18 = vadd.f32 %v4409_v5, %v1118_v14  ;;  %v1759_v19 = vadd.f32 %v4409_v5, %v1758_v15  ;;  %v252_v10 = vld [vmem:[%s4917_s0 + $0x768] sm:$0xff]  ;;  %v253_v14 = vld [vmem:[%s4917_s0 + $0x770] sm:$0xff] }
  0xc9   :  { %v3191_v20 = vpop.f32.mrf.mxu0  ;;  %3334 = vmatmul.mubr.msk.f32.gmra.mxu0 %vm279_vm1, %v114_v12  ;;  %v3383_v21 = vpop.f32.mrf.mxu1  ;;  %3526 = vmatmul.mubr.msk.f32.gmra.mxu1 %vm279_vm1, %v242_v13  ;;  %v125_v13 = vld [vmem:[%s4917_s0 + $0x370] sm:$0xff] }
  0xca   :  { %2397 = vst [vmem:[#allocation2] sm:$0xff] %v1119_v18  ;;  %2525 = vst [vmem:[#allocation2 + $0x400] sm:$0xff] %v1759_v19  ;;  %v1134_v22 = vadd.f32 %v3191_v20, %v4409_v5  ;;  %v1774_v23 = vadd.f32 %v3383_v21, %v4409_v5  ;;  %3336 = vmatprep.mubr.msk.f32.mxu0 %vm279_vm1, %v115_v16  ;;  %3528 = vmatprep.mubr.msk.f32.mxu1 %vm279_vm1, %v243_v17  ;;  %v126_v21 = vld [vmem:[%s4917_s0 + $0x378] sm:$0xff] }
  0xcb   :  { %v1128_v26 = vpop.f32.mrf.mxu0  ;;  %v1768_v27 = vpop.f32.mrf.mxu1 }
  0xcc   :  { %2400 = vst [vmem:[#allocation2 + $0x18] sm:$0xff] %v1134_v22  ;;  %2528 = vst [vmem:[#allocation2 + $0x418] sm:$0xff] %v1774_v23  ;;  %v1129_v30 = vadd.f32 %v4409_v5, %v1128_v26  ;;  %v1769_v31 = vadd.f32 %v4409_v5, %v1768_v27  ;;  %v254_v22 = vld [vmem:[%s4917_s0 + $0x778] sm:$0xff]  ;;  %v255_v26 = vld [vmem:[%s4917_s0 + $0x780] sm:$0xff] }
  0xcd   :  { %v3194_v32 = vpop.f32.mrf.mxu0  ;;  %3337 = vmatmul.mubr.msk.f32.gmra.mxu0 %vm279_vm1, %v116_v24  ;;  %v3386_v33 = vpop.f32.mrf.mxu1  ;;  %3529 = vmatmul.mubr.msk.f32.gmra.mxu1 %vm279_vm1, %v244_v25  ;;  %v127_v25 = vld [vmem:[%s4917_s0 + $0x380] sm:$0xff] }
  0xce   :  { %2399 = vst [vmem:[#allocation2 + $0x10] sm:$0xff] %v1129_v30  ;;  %2527 = vst [vmem:[#allocation2 + $0x410] sm:$0xff] %v1769_v31  ;;  %v1144_v34 = vadd.f32 %v3194_v32, %v4409_v5  ;;  %v1784_v35 = vadd.f32 %v3386_v33, %v4409_v5  ;;  %3339 = vmatprep.mubr.msk.f32.mxu0 %vm279_vm1, %v117_v28  ;;  %3531 = vmatprep.mubr.msk.f32.mxu1 %vm279_vm1, %v245_v29  ;;  %v128_v33 = vld [vmem:[%s4917_s0 + $0x388] sm:$0xff] }
  0xcf   :  { %v1138_v38 = vpop.f32.mrf.mxu0  ;;  %v1778_v39 = vpop.f32.mrf.mxu1 }
  0xd0   :  { %2402 = vst [vmem:[#allocation2 + $0x28] sm:$0xff] %v1144_v34  ;;  %2530 = vst [vmem:[#allocation2 + $0x428] sm:$0xff] %v1784_v35  ;;  %v1139_v42 = vadd.f32 %v4409_v5, %v1138_v38  ;;  %v1779_v43 = vadd.f32 %v4409_v5, %v1778_v39  ;;  %v256_v34 = vld [vmem:[%s4917_s0 + $0x788] sm:$0xff]  ;;  %v257_v38 = vld [vmem:[%s4917_s0 + $0x790] sm:$0xff] }
  0xd1   :  { %v3197_v44 = vpop.f32.mrf.mxu0  ;;  %3340 = vmatmul.mubr.msk.f32.gmra.mxu0 %vm279_vm1, %v118_v36  ;;  %v3389_v45 = vpop.f32.mrf.mxu1  ;;  %3532 = vmatmul.mubr.msk.f32.gmra.mxu1 %vm279_vm1, %v246_v37  ;;  %v129_v37 = vld [vmem:[%s4917_s0 + $0x390] sm:$0xff] }
  0xd2   :  { %2401 = vst [vmem:[#allocation2 + $0x20] sm:$0xff] %v1139_v42  ;;  %2529 = vst [vmem:[#allocation2 + $0x420] sm:$0xff] %v1779_v43  ;;  %v1154_v46 = vadd.f32 %v3197_v44, %v4409_v5  ;;  %v1794_v47 = vadd.f32 %v3389_v45, %v4409_v5  ;;  %3342 = vmatprep.mubr.msk.f32.mxu0 %vm279_vm1, %v119_v40  ;;  %3534 = vmatprep.mubr.msk.f32.mxu1 %vm279_vm1, %v247_v41  ;;  %v130_v45 = vld [vmem:[%s4917_s0 + $0x398] sm:$0xff] }
  0xd3   :  { %v1148_v50 = vpop.f32.mrf.mxu0  ;;  %v1788_v51 = vpop.f32.mrf.mxu1 }
  0xd4   :  { %2404 = vst [vmem:[#allocation2 + $0x38] sm:$0xff] %v1154_v46  ;;  %2532 = vst [vmem:[#allocation2 + $0x438] sm:$0xff] %v1794_v47  ;;  %v1149_v54 = vadd.f32 %v4409_v5, %v1148_v50  ;;  %v1789_v55 = vadd.f32 %v4409_v5, %v1788_v51  ;;  %v258_v46 = vld [vmem:[%s4917_s0 + $0x798] sm:$0xff]  ;;  %v259_v50 = vld [vmem:[%s4917_s0 + $0x7a0] sm:$0xff] }
  0xd5   :  { %v3200_v56 = vpop.f32.mrf.mxu0  ;;  %3343 = vmatmul.mubr.msk.f32.gmra.mxu0 %vm279_vm1, %v120_v48  ;;  %v3392_v57 = vpop.f32.mrf.mxu1  ;;  %3535 = vmatmul.mubr.msk.f32.gmra.mxu1 %vm279_vm1, %v248_v49  ;;  %v131_v49 = vld [vmem:[%s4917_s0 + $0x3a0] sm:$0xff] }
  0xd6   :  { %2403 = vst [vmem:[#allocation2 + $0x30] sm:$0xff] %v1149_v54  ;;  %2531 = vst [vmem:[#allocation2 + $0x430] sm:$0xff] %v1789_v55  ;;  %v1164_v58 = vadd.f32 %v3200_v56, %v4409_v5  ;;  %v1804_v59 = vadd.f32 %v3392_v57, %v4409_v5  ;;  %3345 = vmatprep.mubr.msk.f32.mxu0 %vm279_vm1, %v121_v52  ;;  %3537 = vmatprep.mubr.msk.f32.mxu1 %vm279_vm1, %v249_v53  ;;  %v132_v57 = vld [vmem:[%s4917_s0 + $0x3a8] sm:$0xff] }
  0xd7   :  { %v1158_v62 = vpop.f32.mrf.mxu0  ;;  %v1798_v63 = vpop.f32.mrf.mxu1 }
  0xd8   :  { %2406 = vst [vmem:[#allocation2 + $0x48] sm:$0xff] %v1164_v58  ;;  %2534 = vst [vmem:[#allocation2 + $0x448] sm:$0xff] %v1804_v59  ;;  %v1159_v2 = vadd.f32 %v4409_v5, %v1158_v62  ;;  %v1799_v3 = vadd.f32 %v4409_v5, %v1798_v63  ;;  %v260_v58 = vld [vmem:[%s4917_s0 + $0x7a8] sm:$0xff]  ;;  %v261_v62 = vld [vmem:[%s4917_s0 + $0x7b0] sm:$0xff] }
  0xd9   :  { %v3203_v4 = vpop.f32.mrf.mxu0  ;;  %3346 = vmatmul.mubr.msk.f32.gmra.mxu0 %vm279_vm1, %v122_v60  ;;  %v3395_v6 = vpop.f32.mrf.mxu1  ;;  %3538 = vmatmul.mubr.msk.f32.gmra.mxu1 %vm279_vm1, %v250_v61  ;;  %v133_v61 = vld [vmem:[%s4917_s0 + $0x3b0] sm:$0xff] }
  0xda   :  { %2405 = vst [vmem:[#allocation2 + $0x40] sm:$0xff] %v1159_v2  ;;  %2533 = vst [vmem:[#allocation2 + $0x440] sm:$0xff] %v1799_v3  ;;  %v1174_v7 = vadd.f32 %v3203_v4, %v4409_v5  ;;  %v1814_v8 = vadd.f32 %v3395_v6, %v4409_v5  ;;  %3348 = vmatprep.mubr.msk.f32.mxu0 %vm279_vm1, %v123_v0  ;;  %3540 = vmatprep.mubr.msk.f32.mxu1 %vm279_vm1, %v251_v1  ;;  %v134_v6 = vld [vmem:[%s4917_s0 + $0x3b8] sm:$0xff] }
  0xdb   :  { %v1168_v11 = vpop.f32.mrf.mxu0  ;;  %v1808_v12 = vpop.f32.mrf.mxu1 }
  0xdc   :  { %2408 = vst [vmem:[#allocation2 + $0x58] sm:$0xff] %v1174_v7  ;;  %2536 = vst [vmem:[#allocation2 + $0x458] sm:$0xff] %v1814_v8  ;;  %v1169_v15 = vadd.f32 %v4409_v5, %v1168_v11  ;;  %v1809_v16 = vadd.f32 %v4409_v5, %v1808_v12  ;;  %v262_v7 = vld [vmem:[%s4917_s0 + $0x7b8] sm:$0xff]  ;;  %v263_v11 = vld [vmem:[%s4917_s0 + $0x7c0] sm:$0xff] }
  0xdd   :  { %v3206_v17 = vpop.f32.mrf.mxu0  ;;  %3349 = vmatmul.mubr.msk.f32.gmra.mxu0 %vm279_vm1, %v124_v9  ;;  %v3398_v18 = vpop.f32.mrf.mxu1  ;;  %3541 = vmatmul.mubr.msk.f32.gmra.mxu1 %vm279_vm1, %v252_v10  ;;  %v135_v10 = vld [vmem:[%s4917_s0 + $0x3c0] sm:$0xff] }
  0xde   :  { %2407 = vst [vmem:[#allocation2 + $0x50] sm:$0xff] %v1169_v15  ;;  %2535 = vst [vmem:[#allocation2 + $0x450] sm:$0xff] %v1809_v16  ;;  %v1184_v19 = vadd.f32 %v3206_v17, %v4409_v5  ;;  %v1824_v20 = vadd.f32 %v3398_v18, %v4409_v5  ;;  %3351 = vmatprep.mubr.msk.f32.mxu0 %vm279_vm1, %v125_v13  ;;  %3543 = vmatprep.mubr.msk.f32.mxu1 %vm279_vm1, %v253_v14  ;;  %v136_v18 = vld [vmem:[%s4917_s0 + $0x3c8] sm:$0xff] }
  0xdf   :  { %v1178_v23 = vpop.f32.mrf.mxu0  ;;  %v1818_v24 = vpop.f32.mrf.mxu1 }
  0xe0   :  { %2410 = vst [vmem:[#allocation2 + $0x68] sm:$0xff] %v1184_v19  ;;  %2538 = vst [vmem:[#allocation2 + $0x468] sm:$0xff] %v1824_v20  ;;  %v1179_v27 = vadd.f32 %v4409_v5, %v1178_v23  ;;  %v1819_v28 = vadd.f32 %v4409_v5, %v1818_v24  ;;  %v264_v19 = vld [vmem:[%s4917_s0 + $0x7c8] sm:$0xff]  ;;  %v265_v23 = vld [vmem:[%s4917_s0 + $0x7d0] sm:$0xff] }
  0xe1   :  { %v3209_v29 = vpop.f32.mrf.mxu0  ;;  %3352 = vmatmul.mubr.msk.f32.gmra.mxu0 %vm279_vm1, %v126_v21  ;;  %v3401_v30 = vpop.f32.mrf.mxu1  ;;  %3544 = vmatmul.mubr.msk.f32.gmra.mxu1 %vm279_vm1, %v254_v22  ;;  %v137_v22 = vld [vmem:[%s4917_s0 + $0x3d0] sm:$0xff] }
  0xe2   :  { %2409 = vst [vmem:[#allocation2 + $0x60] sm:$0xff] %v1179_v27  ;;  %2537 = vst [vmem:[#allocation2 + $0x460] sm:$0xff] %v1819_v28  ;;  %v1194_v31 = vadd.f32 %v3209_v29, %v4409_v5  ;;  %v1834_v32 = vadd.f32 %v3401_v30, %v4409_v5  ;;  %3354 = vmatprep.mubr.msk.f32.mxu0 %vm279_vm1, %v127_v25  ;;  %3546 = vmatprep.mubr.msk.f32.mxu1 %vm279_vm1, %v255_v26  ;;  %v138_v30 = vld [vmem:[%s4917_s0 + $0x3d8] sm:$0xff] }
  0xe3   :  { %v1188_v35 = vpop.f32.mrf.mxu0  ;;  %v1828_v36 = vpop.f32.mrf.mxu1 }
  0xe4   :  { %2412 = vst [vmem:[#allocation2 + $0x78] sm:$0xff] %v1194_v31  ;;  %2540 = vst [vmem:[#allocation2 + $0x478] sm:$0xff] %v1834_v32  ;;  %v1189_v39 = vadd.f32 %v4409_v5, %v1188_v35  ;;  %v1829_v40 = vadd.f32 %v4409_v5, %v1828_v36  ;;  %v266_v31 = vld [vmem:[%s4917_s0 + $0x7d8] sm:$0xff]  ;;  %v267_v35 = vld [vmem:[%s4917_s0 + $0x7e0] sm:$0xff] }
  0xe5   :  { %v3212_v41 = vpop.f32.mrf.mxu0  ;;  %3355 = vmatmul.mubr.msk.f32.gmra.mxu0 %vm279_vm1, %v128_v33  ;;  %v3404_v42 = vpop.f32.mrf.mxu1  ;;  %3547 = vmatmul.mubr.msk.f32.gmra.mxu1 %vm279_vm1, %v256_v34  ;;  %v139_v34 = vld [vmem:[%s4917_s0 + $0x3e0] sm:$0xff] }
  0xe6   :  { %2411 = vst [vmem:[#allocation2 + $0x70] sm:$0xff] %v1189_v39  ;;  %2539 = vst [vmem:[#allocation2 + $0x470] sm:$0xff] %v1829_v40  ;;  %v1204_v43 = vadd.f32 %v3212_v41, %v4409_v5  ;;  %v1844_v44 = vadd.f32 %v3404_v42, %v4409_v5  ;;  %3357 = vmatprep.mubr.msk.f32.mxu0 %vm279_vm1, %v129_v37  ;;  %3549 = vmatprep.mubr.msk.f32.mxu1 %vm279_vm1, %v257_v38  ;;  %v140_v42 = vld [vmem:[%s4917_s0 + $0x3e8] sm:$0xff] }
  0xe7   :  { %v1198_v47 = vpop.f32.mrf.mxu0  ;;  %v1838_v48 = vpop.f32.mrf.mxu1 }
  0xe8   :  { %2414 = vst [vmem:[#allocation2 + $0x88] sm:$0xff] %v1204_v43  ;;  %2542 = vst [vmem:[#allocation2 + $0x488] sm:$0xff] %v1844_v44  ;;  %v1199_v51 = vadd.f32 %v4409_v5, %v1198_v47  ;;  %v1839_v52 = vadd.f32 %v4409_v5, %v1838_v48  ;;  %v268_v43 = vld [vmem:[%s4917_s0 + $0x7e8] sm:$0xff]  ;;  %v269_v47 = vld [vmem:[%s4917_s0 + $0x7f0] sm:$0xff] }
  0xe9   :  { %v3215_v53 = vpop.f32.mrf.mxu0  ;;  %3358 = vmatmul.mubr.msk.f32.gmra.mxu0 %vm279_vm1, %v130_v45  ;;  %v3407_v54 = vpop.f32.mrf.mxu1  ;;  %3550 = vmatmul.mubr.msk.f32.gmra.mxu1 %vm279_vm1, %v258_v46  ;;  %v141_v46 = vld [vmem:[%s4917_s0 + $0x3f0] sm:$0xff] }
  0xea   :  { %2413 = vst [vmem:[#allocation2 + $0x80] sm:$0xff] %v1199_v51  ;;  %2541 = vst [vmem:[#allocation2 + $0x480] sm:$0xff] %v1839_v52  ;;  %v1214_v55 = vadd.f32 %v3215_v53, %v4409_v5  ;;  %v1854_v56 = vadd.f32 %v3407_v54, %v4409_v5  ;;  %3360 = vmatprep.mubr.msk.f32.mxu0 %vm279_vm1, %v131_v49  ;;  %3552 = vmatprep.mubr.msk.f32.mxu1 %vm279_vm1, %v259_v50  ;;  %v142_v54 = vld [vmem:[%s4917_s0 + $0x3f8] sm:$0xff] }
  0xeb   :  { %v1208_v59 = vpop.f32.mrf.mxu0  ;;  %v1848_v60 = vpop.f32.mrf.mxu1 }
  0xec   :  { %2416 = vst [vmem:[#allocation2 + $0x98] sm:$0xff] %v1214_v55  ;;  %2544 = vst [vmem:[#allocation2 + $0x498] sm:$0xff] %v1854_v56  ;;  %v1209_v63 = vadd.f32 %v4409_v5, %v1208_v59  ;;  %v1849_v0 = vadd.f32 %v4409_v5, %v1848_v60  ;;  %v270_v55 = vld [vmem:[%s4917_s0 + $0x7f8] sm:$0xff] }
  0xed   :  { %v3218_v1 = vpop.f32.mrf.mxu0  ;;  %3361 = vmatmul.mubr.msk.f32.gmra.mxu0 %vm279_vm1, %v132_v57  ;;  %v3410_v2 = vpop.f32.mrf.mxu1  ;;  %3553 = vmatmul.mubr.msk.f32.gmra.mxu1 %vm279_vm1, %v260_v58 }
  0xee   :  { %2415 = vst [vmem:[#allocation2 + $0x90] sm:$0xff] %v1209_v63  ;;  %2543 = vst [vmem:[#allocation2 + $0x490] sm:$0xff] %v1849_v0  ;;  %v1224_v3 = vadd.f32 %v3218_v1, %v4409_v5  ;;  %v1864_v4 = vadd.f32 %v3410_v2, %v4409_v5  ;;  %3363 = vmatprep.mubr.msk.f32.mxu0 %vm279_vm1, %v133_v61  ;;  %3555 = vmatprep.mubr.msk.f32.mxu1 %vm279_vm1, %v261_v62 }
  0xef   :  { %v1218_v8 = vpop.f32.mrf.mxu0  ;;  %v1858_v9 = vpop.f32.mrf.mxu1 }
  0xf0   :  { %2418 = vst [vmem:[#allocation2 + $0xa8] sm:$0xff] %v1224_v3  ;;  %2546 = vst [vmem:[#allocation2 + $0x4a8] sm:$0xff] %v1864_v4  ;;  %v1219_v12 = vadd.f32 %v4409_v5, %v1218_v8  ;;  %v1859_v13 = vadd.f32 %v4409_v5, %v1858_v9 }
  0xf1   :  { %v3221_v14 = vpop.f32.mrf.mxu0  ;;  %3364 = vmatmul.mubr.msk.f32.gmra.mxu0 %vm279_vm1, %v134_v6  ;;  %v3413_v15 = vpop.f32.mrf.mxu1  ;;  %3556 = vmatmul.mubr.msk.f32.gmra.mxu1 %vm279_vm1, %v262_v7 }
  0xf2   :  { %2417 = vst [vmem:[#allocation2 + $0xa0] sm:$0xff] %v1219_v12  ;;  %2545 = vst [vmem:[#allocation2 + $0x4a0] sm:$0xff] %v1859_v13  ;;  %v1234_v16 = vadd.f32 %v3221_v14, %v4409_v5  ;;  %v1874_v17 = vadd.f32 %v3413_v15, %v4409_v5  ;;  %3366 = vmatprep.mubr.msk.f32.mxu0 %vm279_vm1, %v135_v10  ;;  %3558 = vmatprep.mubr.msk.f32.mxu1 %vm279_vm1, %v263_v11 }
  0xf3   :  { %v1228_v20 = vpop.f32.mrf.mxu0  ;;  %v1868_v21 = vpop.f32.mrf.mxu1 }
  0xf4   :  { %2420 = vst [vmem:[#allocation2 + $0xb8] sm:$0xff] %v1234_v16  ;;  %2548 = vst [vmem:[#allocation2 + $0x4b8] sm:$0xff] %v1874_v17  ;;  %v1229_v24 = vadd.f32 %v4409_v5, %v1228_v20  ;;  %v1869_v25 = vadd.f32 %v4409_v5, %v1868_v21 }
  0xf5   :  { %v3224_v26 = vpop.f32.mrf.mxu0  ;;  %3367 = vmatmul.mubr.msk.f32.gmra.mxu0 %vm279_vm1, %v136_v18  ;;  %v3416_v27 = vpop.f32.mrf.mxu1  ;;  %3559 = vmatmul.mubr.msk.f32.gmra.mxu1 %vm279_vm1, %v264_v19 }
  0xf6   :  { %2419 = vst [vmem:[#allocation2 + $0xb0] sm:$0xff] %v1229_v24  ;;  %2547 = vst [vmem:[#allocation2 + $0x4b0] sm:$0xff] %v1869_v25  ;;  %v1244_v28 = vadd.f32 %v3224_v26, %v4409_v5  ;;  %v1884_v29 = vadd.f32 %v3416_v27, %v4409_v5  ;;  %3369 = vmatprep.mubr.msk.f32.mxu0 %vm279_vm1, %v137_v22  ;;  %3561 = vmatprep.mubr.msk.f32.mxu1 %vm279_vm1, %v265_v23 }
  0xf7   :  { %v1238_v32 = vpop.f32.mrf.mxu0  ;;  %v1878_v33 = vpop.f32.mrf.mxu1 }
  0xf8   :  { %2422 = vst [vmem:[#allocation2 + $0xc8] sm:$0xff] %v1244_v28  ;;  %2550 = vst [vmem:[#allocation2 + $0x4c8] sm:$0xff] %v1884_v29  ;;  %v1239_v36 = vadd.f32 %v4409_v5, %v1238_v32  ;;  %v1879_v37 = vadd.f32 %v4409_v5, %v1878_v33 }
  0xf9   :  { %v3227_v38 = vpop.f32.mrf.mxu0  ;;  %3370 = vmatmul.mubr.msk.f32.gmra.mxu0 %vm279_vm1, %v138_v30  ;;  %v3419_v39 = vpop.f32.mrf.mxu1  ;;  %3562 = vmatmul.mubr.msk.f32.gmra.mxu1 %vm279_vm1, %v266_v31 }
  0xfa   :  { %2421 = vst [vmem:[#allocation2 + $0xc0] sm:$0xff] %v1239_v36  ;;  %2549 = vst [vmem:[#allocation2 + $0x4c0] sm:$0xff] %v1879_v37  ;;  %v1254_v40 = vadd.f32 %v3227_v38, %v4409_v5  ;;  %v1894_v41 = vadd.f32 %v3419_v39, %v4409_v5  ;;  %3372 = vmatprep.mubr.msk.f32.mxu0 %vm279_vm1, %v139_v34  ;;  %3564 = vmatprep.mubr.msk.f32.mxu1 %vm279_vm1, %v267_v35 }
  0xfb   :  { %v1248_v44 = vpop.f32.mrf.mxu0  ;;  %v1888_v45 = vpop.f32.mrf.mxu1 }
  0xfc   :  { %2424 = vst [vmem:[#allocation2 + $0xd8] sm:$0xff] %v1254_v40  ;;  %2552 = vst [vmem:[#allocation2 + $0x4d8] sm:$0xff] %v1894_v41  ;;  %v1249_v48 = vadd.f32 %v4409_v5, %v1248_v44  ;;  %v1889_v49 = vadd.f32 %v4409_v5, %v1888_v45 }
  0xfd   :  { %v3230_v50 = vpop.f32.mrf.mxu0  ;;  %3373 = vmatmul.mubr.msk.f32.gmra.mxu0 %vm279_vm1, %v140_v42  ;;  %v3422_v51 = vpop.f32.mrf.mxu1  ;;  %3565 = vmatmul.mubr.msk.f32.gmra.mxu1 %vm279_vm1, %v268_v43 }
  0xfe   :  { %2423 = vst [vmem:[#allocation2 + $0xd0] sm:$0xff] %v1249_v48  ;;  %2551 = vst [vmem:[#allocation2 + $0x4d0] sm:$0xff] %v1889_v49  ;;  %v1264_v52 = vadd.f32 %v3230_v50, %v4409_v5  ;;  %v1904_v53 = vadd.f32 %v3422_v51, %v4409_v5  ;;  %3375 = vmatprep.mubr.msk.f32.mxu0 %vm279_vm1, %v141_v46  ;;  %3567 = vmatprep.mubr.msk.f32.mxu1 %vm279_vm1, %v269_v47 }
  0xff   :  { %v1258_v56 = vpop.f32.mrf.mxu0  ;;  %v1898_v57 = vpop.f32.mrf.mxu1 }
 0x100   :  { %2426 = vst [vmem:[#allocation2 + $0xe8] sm:$0xff] %v1264_v52  ;;  %2554 = vst [vmem:[#allocation2 + $0x4e8] sm:$0xff] %v1904_v53  ;;  %v1259_v58 = vadd.f32 %v4409_v5, %v1258_v56  ;;  %v1899_v59 = vadd.f32 %v4409_v5, %v1898_v57 }
 0x101   :  { %v3233_v60 = vpop.f32.mrf.mxu0  ;;  %3376 = vmatmul.mubr.msk.f32.gmra.mxu0 %vm279_vm1, %v142_v54  ;;  %v3425_v61 = vpop.f32.mrf.mxu1  ;;  %3568 = vmatmul.mubr.msk.f32.gmra.mxu1 %vm279_vm1, %v270_v55 }
 0x102   :  { %2425 = vst [vmem:[#allocation2 + $0xe0] sm:$0xff] %v1259_v58  ;;  %2553 = vst [vmem:[#allocation2 + $0x4e0] sm:$0xff] %v1899_v59  ;;  %v1274_v62 = vadd.f32 %v3233_v60, %v4409_v5  ;;  %v1914_v63 = vadd.f32 %v3425_v61, %v4409_v5 }
 0x103   :  { %v1268_v0 = vpop.f32.mrf.mxu0  ;;  %v1908_v1 = vpop.f32.mrf.mxu1 }
 0x104   :  { %2428 = vst [vmem:[#allocation2 + $0xf8] sm:$0xff] %v1274_v62  ;;  %2556 = vst [vmem:[#allocation2 + $0x4f8] sm:$0xff] %v1914_v63  ;;  %v1269_v2 = vadd.f32 %v4409_v5, %v1268_v0  ;;  %v1909_v3 = vadd.f32 %v4409_v5, %v1908_v1 }
 0x105   :  { %v3236_v4 = vpop.f32.mrf.mxu0  ;;  %v3428_v6 = vpop.f32.mrf.mxu1 }
 0x106   :  { %2427 = vst [vmem:[#allocation2 + $0xf0] sm:$0xff] %v1269_v2  ;;  %2555 = vst [vmem:[#allocation2 + $0x4f0] sm:$0xff] %v1909_v3  ;;  %v1284_v7 = vadd.f32 %v3236_v4, %v4409_v5  ;;  %v1924_v8 = vadd.f32 %v3428_v6, %v4409_v5 }
 0x107   :  { %v1278_v9 = vpop.f32.mrf.mxu0  ;;  %v1918_v10 = vpop.f32.mrf.mxu1 }
 0x108   :  { %2430 = vst [vmem:[#allocation2 + $0x108] sm:$0xff] %v1284_v7  ;;  %2558 = vst [vmem:[#allocation2 + $0x508] sm:$0xff] %v1924_v8  ;;  %v1279_v11 = vadd.f32 %v4409_v5, %v1278_v9  ;;  %v1919_v12 = vadd.f32 %v4409_v5, %v1918_v10 }
 0x109   :  { %v3239_v13 = vpop.f32.mrf.mxu0  ;;  %v3431_v14 = vpop.f32.mrf.mxu1 }
 0x10a   :  { %2429 = vst [vmem:[#allocation2 + $0x100] sm:$0xff] %v1279_v11  ;;  %2557 = vst [vmem:[#allocation2 + $0x500] sm:$0xff] %v1919_v12  ;;  %v1294_v15 = vadd.f32 %v3239_v13, %v4409_v5  ;;  %v1934_v16 = vadd.f32 %v3431_v14, %v4409_v5 }
 0x10b   :  { %v1288_v17 = vpop.f32.mrf.mxu0  ;;  %v1928_v18 = vpop.f32.mrf.mxu1 }
 0x10c   :  { %2432 = vst [vmem:[#allocation2 + $0x118] sm:$0xff] %v1294_v15  ;;  %2560 = vst [vmem:[#allocation2 + $0x518] sm:$0xff] %v1934_v16  ;;  %v1289_v19 = vadd.f32 %v4409_v5, %v1288_v17  ;;  %v1929_v20 = vadd.f32 %v4409_v5, %v1928_v18 }
 0x10d   :  { %v3242_v21 = vpop.f32.mrf.mxu0  ;;  %v3434_v22 = vpop.f32.mrf.mxu1 }
 0x10e   :  { %2431 = vst [vmem:[#allocation2 + $0x110] sm:$0xff] %v1289_v19  ;;  %2559 = vst [vmem:[#allocation2 + $0x510] sm:$0xff] %v1929_v20  ;;  %v1304_v23 = vadd.f32 %v3242_v21, %v4409_v5  ;;  %v1944_v24 = vadd.f32 %v3434_v22, %v4409_v5 }
 0x10f   :  { %v1298_v25 = vpop.f32.mrf.mxu0  ;;  %v1938_v26 = vpop.f32.mrf.mxu1 }
 0x110   :  { %2434 = vst [vmem:[#allocation2 + $0x128] sm:$0xff] %v1304_v23  ;;  %2562 = vst [vmem:[#allocation2 + $0x528] sm:$0xff] %v1944_v24  ;;  %v1299_v27 = vadd.f32 %v4409_v5, %v1298_v25  ;;  %v1939_v28 = vadd.f32 %v4409_v5, %v1938_v26 }
 0x111   :  { %v3245_v29 = vpop.f32.mrf.mxu0  ;;  %v3437_v30 = vpop.f32.mrf.mxu1 }
 0x112   :  { %2433 = vst [vmem:[#allocation2 + $0x120] sm:$0xff] %v1299_v27  ;;  %2561 = vst [vmem:[#allocation2 + $0x520] sm:$0xff] %v1939_v28  ;;  %v1314_v31 = vadd.f32 %v3245_v29, %v4409_v5  ;;  %v1954_v32 = vadd.f32 %v3437_v30, %v4409_v5 }
 0x113   :  { %v1308_v33 = vpop.f32.mrf.mxu0  ;;  %v1948_v34 = vpop.f32.mrf.mxu1 }
 0x114   :  { %2436 = vst [vmem:[#allocation2 + $0x138] sm:$0xff] %v1314_v31  ;;  %2564 = vst [vmem:[#allocation2 + $0x538] sm:$0xff] %v1954_v32  ;;  %v1309_v35 = vadd.f32 %v4409_v5, %v1308_v33  ;;  %v1949_v36 = vadd.f32 %v4409_v5, %v1948_v34 }
 0x115   :  { %v3248_v37 = vpop.f32.mrf.mxu0  ;;  %v3440_v38 = vpop.f32.mrf.mxu1 }
 0x116   :  { %2435 = vst [vmem:[#allocation2 + $0x130] sm:$0xff] %v1309_v35  ;;  %2563 = vst [vmem:[#allocation2 + $0x530] sm:$0xff] %v1949_v36  ;;  %v1324_v39 = vadd.f32 %v3248_v37, %v4409_v5  ;;  %v1964_v40 = vadd.f32 %v3440_v38, %v4409_v5 }
 0x117   :  { %v1318_v41 = vpop.f32.mrf.mxu0  ;;  %v1958_v42 = vpop.f32.mrf.mxu1 }
 0x118   :  { %2438 = vst [vmem:[#allocation2 + $0x148] sm:$0xff] %v1324_v39  ;;  %2566 = vst [vmem:[#allocation2 + $0x548] sm:$0xff] %v1964_v40  ;;  %v1319_v43 = vadd.f32 %v4409_v5, %v1318_v41  ;;  %v1959_v44 = vadd.f32 %v4409_v5, %v1958_v42 }
 0x119   :  { %v3251_v45 = vpop.f32.mrf.mxu0  ;;  %v3443_v46 = vpop.f32.mrf.mxu1 }
 0x11a   :  { %2437 = vst [vmem:[#allocation2 + $0x140] sm:$0xff] %v1319_v43  ;;  %2565 = vst [vmem:[#allocation2 + $0x540] sm:$0xff] %v1959_v44  ;;  %v1334_v47 = vadd.f32 %v3251_v45, %v4409_v5  ;;  %v1974_v48 = vadd.f32 %v3443_v46, %v4409_v5 }
 0x11b   :  { %v1328_v49 = vpop.f32.mrf.mxu0  ;;  %v1968_v50 = vpop.f32.mrf.mxu1 }
 0x11c   :  { %2440 = vst [vmem:[#allocation2 + $0x158] sm:$0xff] %v1334_v47  ;;  %2568 = vst [vmem:[#allocation2 + $0x558] sm:$0xff] %v1974_v48  ;;  %v1329_v51 = vadd.f32 %v4409_v5, %v1328_v49  ;;  %v1969_v52 = vadd.f32 %v4409_v5, %v1968_v50 }
 0x11d   :  { %v3254_v53 = vpop.f32.mrf.mxu0  ;;  %v3446_v54 = vpop.f32.mrf.mxu1 }
 0x11e   :  { %2439 = vst [vmem:[#allocation2 + $0x150] sm:$0xff] %v1329_v51  ;;  %2567 = vst [vmem:[#allocation2 + $0x550] sm:$0xff] %v1969_v52  ;;  %v1344_v55 = vadd.f32 %v3254_v53, %v4409_v5  ;;  %v1984_v56 = vadd.f32 %v3446_v54, %v4409_v5 }
 0x11f   :  { %v1338_v57 = vpop.f32.mrf.mxu0  ;;  %v1978_v58 = vpop.f32.mrf.mxu1 }
 0x120   :  { %2442 = vst [vmem:[#allocation2 + $0x168] sm:$0xff] %v1344_v55  ;;  %2570 = vst [vmem:[#allocation2 + $0x568] sm:$0xff] %v1984_v56  ;;  %v1339_v59 = vadd.f32 %v4409_v5, %v1338_v57  ;;  %v1979_v60 = vadd.f32 %v4409_v5, %v1978_v58 }
 0x121   :  { %v3257_v61 = vpop.f32.mrf.mxu0  ;;  %v3449_v62 = vpop.f32.mrf.mxu1 }
 0x122   :  { %2441 = vst [vmem:[#allocation2 + $0x160] sm:$0xff] %v1339_v59  ;;  %2569 = vst [vmem:[#allocation2 + $0x560] sm:$0xff] %v1979_v60  ;;  %v1354_v63 = vadd.f32 %v3257_v61, %v4409_v5  ;;  %v1994_v0 = vadd.f32 %v3449_v62, %v4409_v5 }
 0x123   :  { %v1348_v1 = vpop.f32.mrf.mxu0  ;;  %v1988_v2 = vpop.f32.mrf.mxu1 }
 0x124   :  { %2444 = vst [vmem:[#allocation2 + $0x178] sm:$0xff] %v1354_v63  ;;  %2572 = vst [vmem:[#allocation2 + $0x578] sm:$0xff] %v1994_v0  ;;  %v1349_v3 = vadd.f32 %v4409_v5, %v1348_v1  ;;  %v1989_v4 = vadd.f32 %v4409_v5, %v1988_v2 }
 0x125   :  { %v3260_v6 = vpop.f32.mrf.mxu0  ;;  %v3452_v7 = vpop.f32.mrf.mxu1 }
 0x126   :  { %2443 = vst [vmem:[#allocation2 + $0x170] sm:$0xff] %v1349_v3  ;;  %2571 = vst [vmem:[#allocation2 + $0x570] sm:$0xff] %v1989_v4  ;;  %v1364_v8 = vadd.f32 %v3260_v6, %v4409_v5  ;;  %v2004_v9 = vadd.f32 %v3452_v7, %v4409_v5 }
 0x127   :  { %v1358_v10 = vpop.f32.mrf.mxu0  ;;  %v1998_v11 = vpop.f32.mrf.mxu1 }
 0x128   :  { %2446 = vst [vmem:[#allocation2 + $0x188] sm:$0xff] %v1364_v8  ;;  %2574 = vst [vmem:[#allocation2 + $0x588] sm:$0xff] %v2004_v9  ;;  %v1359_v12 = vadd.f32 %v4409_v5, %v1358_v10  ;;  %v1999_v13 = vadd.f32 %v4409_v5, %v1998_v11 }
 0x129   :  { %v3263_v14 = vpop.f32.mrf.mxu0  ;;  %v3455_v15 = vpop.f32.mrf.mxu1 }
 0x12a   :  { %2445 = vst [vmem:[#allocation2 + $0x180] sm:$0xff] %v1359_v12  ;;  %2573 = vst [vmem:[#allocation2 + $0x580] sm:$0xff] %v1999_v13  ;;  %v1374_v16 = vadd.f32 %v3263_v14, %v4409_v5  ;;  %v2014_v17 = vadd.f32 %v3455_v15, %v4409_v5  ;;  %v4786_v13 = vld [vmem:[%s4919_s2] ss:$0 sm:$0xff]  ;;  %s3598_s2 = smov [#allocation2]  }
 0x12b   :  { %v1368_v18 = vpop.f32.mrf.mxu0  ;;  %v2008_v19 = vpop.f32.mrf.mxu1  ;;  %s2658_s24 = sshll.u32 %s3598_s2, 4  ;;  %s2659_s24 = int_to_ptr.vmem [resolvable:$true] %s2658_s24 }
 0x12c   :  { %2448 = vst [vmem:[#allocation2 + $0x198] sm:$0xff] %v1374_v16  ;;  %2576 = vst [vmem:[#allocation2 + $0x598] sm:$0xff] %v2014_v17  ;;  %v1369_v20 = vadd.f32 %v4409_v5, %v1368_v18  ;;  %v2009_v21 = vadd.f32 %v4409_v5, %v2008_v19  ;;  %s3576_s25 = scalar_lea.vmem %s2659_s24, 32768  ;;  %p3581_p1 = scmp.lt.s32.totalorder %s2659_s24, %s2659_s24 }
 0x12d   :  { %v3266_v22 = vpop.f32.mrf.mxu0  ;;  %v3458_v23 = vpop.f32.mrf.mxu1  ;;  %p3577_p0 = scmp.ne.s32.totalorder %s2659_s24, %s3576_s25  ;;  %p3582_p2 = scmp.lt.s32.totalorder %s3576_s25, %s3576_s25 }
 0x12e   :  { %2447 = vst [vmem:[#allocation2 + $0x190] sm:$0xff] %v1369_v20  ;;  %2575 = vst [vmem:[#allocation2 + $0x590] sm:$0xff] %v2009_v21  ;;  %v1384_v24 = vadd.f32 %v3266_v22, %v4409_v5  ;;  %v2024_v25 = vadd.f32 %v3458_v23, %v4409_v5 }
 0x12f   :  { %v1378_v26 = vpop.f32.mrf.mxu0  ;;  %v2018_v27 = vpop.f32.mrf.mxu1  ;;  %p3583_p3 = por %p3582_p2, %p3581_p1 }
 0x130   :  { %2450 = vst [vmem:[#allocation2 + $0x1a8] sm:$0xff] %v1384_v24  ;;  %2578 = vst [vmem:[#allocation2 + $0x5a8] sm:$0xff] %v2024_v25  ;;  %v1379_v28 = vadd.f32 %v4409_v5, %v1378_v26  ;;  %v2019_v29 = vadd.f32 %v4409_v5, %v2018_v27 }
 0x131   :  { %v3269_v30 = vpop.f32.mrf.mxu0  ;;  %v3461_v31 = vpop.f32.mrf.mxu1  ;;  %p3584_p4 = pnand %p3583_p3, %p3577_p0 }
 0x132   :  { %2449 = vst [vmem:[#allocation2 + $0x1a0] sm:$0xff] %v1379_v28  ;;  %2577 = vst [vmem:[#allocation2 + $0x5a0] sm:$0xff] %v2019_v29  ;;  %v1394_v32 = vadd.f32 %v3269_v30, %v4409_v5  ;;  %v2034_v33 = vadd.f32 %v3461_v31, %v4409_v5 }
 0x133   :  { %v1388_v34 = vpop.f32.mrf.mxu0  ;;  %v2028_v35 = vpop.f32.mrf.mxu1 }
 0x134   :  { %2452 = vst [vmem:[#allocation2 + $0x1b8] sm:$0xff] %v1394_v32  ;;  %2580 = vst [vmem:[#allocation2 + $0x5b8] sm:$0xff] %v2034_v33  ;;  %v1389_v36 = vadd.f32 %v4409_v5, %v1388_v34  ;;  %v2029_v37 = vadd.f32 %v4409_v5, %v2028_v35 }
 0x135   :  { %v3272_v38 = vpop.f32.mrf.mxu0  ;;  %v3464_v39 = vpop.f32.mrf.mxu1 }
 0x136   :  { %2451 = vst [vmem:[#allocation2 + $0x1b0] sm:$0xff] %v1389_v36  ;;  %2579 = vst [vmem:[#allocation2 + $0x5b0] sm:$0xff] %v2029_v37  ;;  %v1404_v40 = vadd.f32 %v3272_v38, %v4409_v5  ;;  %v2044_v41 = vadd.f32 %v3464_v39, %v4409_v5 }
 0x137   :  { %v1398_v42 = vpop.f32.mrf.mxu0  ;;  %v2038_v43 = vpop.f32.mrf.mxu1 }
 0x138   :  { %2454 = vst [vmem:[#allocation2 + $0x1c8] sm:$0xff] %v1404_v40  ;;  %2582 = vst [vmem:[#allocation2 + $0x5c8] sm:$0xff] %v2044_v41  ;;  %v1399_v44 = vadd.f32 %v4409_v5, %v1398_v42  ;;  %v2039_v45 = vadd.f32 %v4409_v5, %v2038_v43 }
 0x139   :  { %v3275_v46 = vpop.f32.mrf.mxu0  ;;  %v3467_v47 = vpop.f32.mrf.mxu1 }
 0x13a   :  { %2453 = vst [vmem:[#allocation2 + $0x1c0] sm:$0xff] %v1399_v44  ;;  %2581 = vst [vmem:[#allocation2 + $0x5c0] sm:$0xff] %v2039_v45  ;;  %v1414_v48 = vadd.f32 %v3275_v46, %v4409_v5  ;;  %v2054_v49 = vadd.f32 %v3467_v47, %v4409_v5 }
 0x13b   :  { %v1408_v50 = vpop.f32.mrf.mxu0  ;;  %v2048_v51 = vpop.f32.mrf.mxu1 }
 0x13c   :  { %2456 = vst [vmem:[#allocation2 + $0x1d8] sm:$0xff] %v1414_v48  ;;  %2584 = vst [vmem:[#allocation2 + $0x5d8] sm:$0xff] %v2054_v49  ;;  %v1409_v52 = vadd.f32 %v4409_v5, %v1408_v50  ;;  %v2049_v53 = vadd.f32 %v4409_v5, %v2048_v51 }
 0x13d   :  { %v3278_v54 = vpop.f32.mrf.mxu0  ;;  %v3470_v55 = vpop.f32.mrf.mxu1 }
 0x13e   :  { %2455 = vst [vmem:[#allocation2 + $0x1d0] sm:$0xff] %v1409_v52  ;;  %2583 = vst [vmem:[#allocation2 + $0x5d0] sm:$0xff] %v2049_v53  ;;  %v1424_v56 = vadd.f32 %v3278_v54, %v4409_v5  ;;  %v2064_v57 = vadd.f32 %v3470_v55, %v4409_v5 }
 0x13f   :  { %v1418_v58 = vpop.f32.mrf.mxu0  ;;  %v2058_v59 = vpop.f32.mrf.mxu1 }
 0x140   :  { %2458 = vst [vmem:[#allocation2 + $0x1e8] sm:$0xff] %v1424_v56  ;;  %2586 = vst [vmem:[#allocation2 + $0x5e8] sm:$0xff] %v2064_v57  ;;  %v1419_v60 = vadd.f32 %v4409_v5, %v1418_v58  ;;  %v2059_v61 = vadd.f32 %v4409_v5, %v2058_v59 }
 0x141   :  { %v3281_v62 = vpop.f32.mrf.mxu0  ;;  %v3473_v63 = vpop.f32.mrf.mxu1 }
 0x142   :  { %2457 = vst [vmem:[#allocation2 + $0x1e0] sm:$0xff] %v1419_v60  ;;  %2585 = vst [vmem:[#allocation2 + $0x5e0] sm:$0xff] %v2059_v61  ;;  %v1434_v0 = vadd.f32 %v3281_v62, %v4409_v5  ;;  %v2074_v1 = vadd.f32 %v3473_v63, %v4409_v5 }
 0x143   :  { %v1428_v2 = vpop.f32.mrf.mxu0  ;;  %v2068_v3 = vpop.f32.mrf.mxu1 }
 0x144   :  { %2460 = vst [vmem:[#allocation2 + $0x1f8] sm:$0xff] %v1434_v0  ;;  %2588 = vst [vmem:[#allocation2 + $0x5f8] sm:$0xff] %v2074_v1  ;;  %v1429_v4 = vadd.f32 %v4409_v5, %v1428_v2  ;;  %v2069_v6 = vadd.f32 %v4409_v5, %v2068_v3 }
 0x145   :  { %v3284_v7 = vpop.f32.mrf.mxu0  ;;  %v3476_v8 = vpop.f32.mrf.mxu1 }
 0x146   :  { %2459 = vst [vmem:[#allocation2 + $0x1f0] sm:$0xff] %v1429_v4  ;;  %2587 = vst [vmem:[#allocation2 + $0x5f0] sm:$0xff] %v2069_v6  ;;  %v1444_v9 = vadd.f32 %v3284_v7, %v4409_v5  ;;  %v2084_v10 = vadd.f32 %v3476_v8, %v4409_v5 }
 0x147   :  { %v1438_v11 = vpop.f32.mrf.mxu0  ;;  %v2078_v12 = vpop.f32.mrf.mxu1 }
 0x148   :  { %2462 = vst [vmem:[#allocation2 + $0x208] sm:$0xff] %v1444_v9  ;;  %2590 = vst [vmem:[#allocation2 + $0x608] sm:$0xff] %v2084_v10  ;;  %v1439_v14 = vadd.f32 %v4786_v13, %v1438_v11  ;;  %v2079_v15 = vadd.f32 %v4786_v13, %v2078_v12 }
 0x149   :  { %v3287_v16 = vpop.f32.mrf.mxu0  ;;  %v3479_v17 = vpop.f32.mrf.mxu1 }
 0x14a   :  { %2461 = vst [vmem:[#allocation2 + $0x200] sm:$0xff] %v1439_v14  ;;  %2589 = vst [vmem:[#allocation2 + $0x600] sm:$0xff] %v2079_v15  ;;  %v1454_v18 = vadd.f32 %v4786_v13, %v3287_v16  ;;  %v2094_v5 = vadd.f32 %v4786_v13, %v3479_v17 }
 0x14b   :  { %v1448_v19 = vpop.f32.mrf.mxu0  ;;  %v2088_v20 = vpop.f32.mrf.mxu1 }
 0x14c   :  { %2464 = vst [vmem:[#allocation2 + $0x218] sm:$0xff] %v1454_v18  ;;  %2592 = vst [vmem:[#allocation2 + $0x618] sm:$0xff] %v2094_v5  ;;  %v1449_v21 = vadd.f32 %v4786_v13, %v1448_v19  ;;  %v2089_v22 = vadd.f32 %v4786_v13, %v2088_v20 }
 0x14d   :  { %v3290_v23 = vpop.f32.mrf.mxu0  ;;  %v3482_v24 = vpop.f32.mrf.mxu1 }
 0x14e   :  { %2463 = vst [vmem:[#allocation2 + $0x210] sm:$0xff] %v1449_v21  ;;  %2591 = vst [vmem:[#allocation2 + $0x610] sm:$0xff] %v2089_v22  ;;  %v1464_v25 = vadd.f32 %v4786_v13, %v3290_v23  ;;  %v2104_v26 = vadd.f32 %v4786_v13, %v3482_v24 }
 0x14f   :  { %v1458_v27 = vpop.f32.mrf.mxu0  ;;  %v2098_v28 = vpop.f32.mrf.mxu1 }
 0x150   :  { %2466 = vst [vmem:[#allocation2 + $0x228] sm:$0xff] %v1464_v25  ;;  %2594 = vst [vmem:[#allocation2 + $0x628] sm:$0xff] %v2104_v26  ;;  %v1459_v29 = vadd.f32 %v4786_v13, %v1458_v27  ;;  %v2099_v30 = vadd.f32 %v4786_v13, %v2098_v28 }
 0x151   :  { %v3293_v31 = vpop.f32.mrf.mxu0  ;;  %v3485_v32 = vpop.f32.mrf.mxu1 }
 0x152   :  { %2465 = vst [vmem:[#allocation2 + $0x220] sm:$0xff] %v1459_v29  ;;  %2593 = vst [vmem:[#allocation2 + $0x620] sm:$0xff] %v2099_v30  ;;  %v1474_v33 = vadd.f32 %v4786_v13, %v3293_v31  ;;  %v2114_v34 = vadd.f32 %v4786_v13, %v3485_v32 }
 0x153   :  { %v1468_v35 = vpop.f32.mrf.mxu0  ;;  %v2108_v36 = vpop.f32.mrf.mxu1 }
 0x154   :  { %2468 = vst [vmem:[#allocation2 + $0x238] sm:$0xff] %v1474_v33  ;;  %2596 = vst [vmem:[#allocation2 + $0x638] sm:$0xff] %v2114_v34  ;;  %v1469_v37 = vadd.f32 %v4786_v13, %v1468_v35  ;;  %v2109_v38 = vadd.f32 %v4786_v13, %v2108_v36 }
 0x155   :  { %v3296_v39 = vpop.f32.mrf.mxu0  ;;  %v3488_v40 = vpop.f32.mrf.mxu1 }
 0x156   :  { %2467 = vst [vmem:[#allocation2 + $0x230] sm:$0xff] %v1469_v37  ;;  %2595 = vst [vmem:[#allocation2 + $0x630] sm:$0xff] %v2109_v38  ;;  %v1484_v41 = vadd.f32 %v4786_v13, %v3296_v39  ;;  %v2124_v42 = vadd.f32 %v4786_v13, %v3488_v40 }
 0x157   :  { %v1478_v43 = vpop.f32.mrf.mxu0  ;;  %v2118_v44 = vpop.f32.mrf.mxu1 }
 0x158   :  { %2470 = vst [vmem:[#allocation2 + $0x248] sm:$0xff] %v1484_v41  ;;  %2598 = vst [vmem:[#allocation2 + $0x648] sm:$0xff] %v2124_v42  ;;  %v1479_v45 = vadd.f32 %v4786_v13, %v1478_v43  ;;  %v2119_v46 = vadd.f32 %v4786_v13, %v2118_v44 }
 0x159   :  { %v3299_v47 = vpop.f32.mrf.mxu0  ;;  %v3491_v48 = vpop.f32.mrf.mxu1 }
 0x15a   :  { %2469 = vst [vmem:[#allocation2 + $0x240] sm:$0xff] %v1479_v45  ;;  %2597 = vst [vmem:[#allocation2 + $0x640] sm:$0xff] %v2119_v46  ;;  %v1494_v49 = vadd.f32 %v4786_v13, %v3299_v47  ;;  %v2134_v50 = vadd.f32 %v4786_v13, %v3491_v48 }
 0x15b   :  { %v1488_v51 = vpop.f32.mrf.mxu0  ;;  %v2128_v52 = vpop.f32.mrf.mxu1 }
 0x15c   :  { %2472 = vst [vmem:[#allocation2 + $0x258] sm:$0xff] %v1494_v49  ;;  %2600 = vst [vmem:[#allocation2 + $0x658] sm:$0xff] %v2134_v50  ;;  %v1489_v53 = vadd.f32 %v4786_v13, %v1488_v51  ;;  %v2129_v54 = vadd.f32 %v4786_v13, %v2128_v52 }
 0x15d   :  { %v3302_v55 = vpop.f32.mrf.mxu0  ;;  %v3494_v56 = vpop.f32.mrf.mxu1 }
 0x15e   :  { %2471 = vst [vmem:[#allocation2 + $0x250] sm:$0xff] %v1489_v53  ;;  %2599 = vst [vmem:[#allocation2 + $0x650] sm:$0xff] %v2129_v54  ;;  %v1504_v57 = vadd.f32 %v4786_v13, %v3302_v55  ;;  %v2144_v58 = vadd.f32 %v4786_v13, %v3494_v56 }
 0x15f   :  { %v1498_v59 = vpop.f32.mrf.mxu0  ;;  %v2138_v60 = vpop.f32.mrf.mxu1 }
 0x160   :  { %2474 = vst [vmem:[#allocation2 + $0x268] sm:$0xff] %v1504_v57  ;;  %2602 = vst [vmem:[#allocation2 + $0x668] sm:$0xff] %v2144_v58  ;;  %v1499_v61 = vadd.f32 %v4786_v13, %v1498_v59  ;;  %v2139_v62 = vadd.f32 %v4786_v13, %v2138_v60 }
 0x161   :  { %v3305_v63 = vpop.f32.mrf.mxu0  ;;  %v3497_v0 = vpop.f32.mrf.mxu1 }
 0x162   :  { %2473 = vst [vmem:[#allocation2 + $0x260] sm:$0xff] %v1499_v61  ;;  %2601 = vst [vmem:[#allocation2 + $0x660] sm:$0xff] %v2139_v62  ;;  %v1514_v1 = vadd.f32 %v4786_v13, %v3305_v63  ;;  %v2154_v2 = vadd.f32 %v4786_v13, %v3497_v0 }
 0x163   :  { %v1508_v3 = vpop.f32.mrf.mxu0  ;;  %v2148_v4 = vpop.f32.mrf.mxu1 }
 0x164   :  { %2476 = vst [vmem:[#allocation2 + $0x278] sm:$0xff] %v1514_v1  ;;  %2604 = vst [vmem:[#allocation2 + $0x678] sm:$0xff] %v2154_v2  ;;  %v1509_v6 = vadd.f32 %v4786_v13, %v1508_v3  ;;  %v2149_v7 = vadd.f32 %v4786_v13, %v2148_v4 }
 0x165   :  { %v3308_v8 = vpop.f32.mrf.mxu0  ;;  %v3500_v9 = vpop.f32.mrf.mxu1 }
 0x166   :  { %2475 = vst [vmem:[#allocation2 + $0x270] sm:$0xff] %v1509_v6  ;;  %2603 = vst [vmem:[#allocation2 + $0x670] sm:$0xff] %v2149_v7  ;;  %v1524_v10 = vadd.f32 %v4786_v13, %v3308_v8  ;;  %v2164_v11 = vadd.f32 %v4786_v13, %v3500_v9 }
 0x167   :  { %v1518_v12 = vpop.f32.mrf.mxu0  ;;  %v2158_v14 = vpop.f32.mrf.mxu1 }
 0x168   :  { %2478 = vst [vmem:[#allocation2 + $0x288] sm:$0xff] %v1524_v10  ;;  %2606 = vst [vmem:[#allocation2 + $0x688] sm:$0xff] %v2164_v11  ;;  %v1519_v15 = vadd.f32 %v4786_v13, %v1518_v12  ;;  %v2159_v16 = vadd.f32 %v4786_v13, %v2158_v14 }
 0x169   :  { %v3311_v17 = vpop.f32.mrf.mxu0  ;;  %v3503_v18 = vpop.f32.mrf.mxu1 }
 0x16a   :  { %2477 = vst [vmem:[#allocation2 + $0x280] sm:$0xff] %v1519_v15  ;;  %2605 = vst [vmem:[#allocation2 + $0x680] sm:$0xff] %v2159_v16  ;;  %v1534_v5 = vadd.f32 %v4786_v13, %v3311_v17  ;;  %v2174_v19 = vadd.f32 %v4786_v13, %v3503_v18 }
 0x16b   :  { %v1528_v20 = vpop.f32.mrf.mxu0  ;;  %v2168_v21 = vpop.f32.mrf.mxu1 }
 0x16c   :  { %2480 = vst [vmem:[#allocation2 + $0x298] sm:$0xff] %v1534_v5  ;;  %2608 = vst [vmem:[#allocation2 + $0x698] sm:$0xff] %v2174_v19  ;;  %v1529_v22 = vadd.f32 %v4786_v13, %v1528_v20  ;;  %v2169_v23 = vadd.f32 %v4786_v13, %v2168_v21 }
 0x16d   :  { %v3314_v24 = vpop.f32.mrf.mxu0  ;;  %v3506_v25 = vpop.f32.mrf.mxu1 }
 0x16e   :  { %2479 = vst [vmem:[#allocation2 + $0x290] sm:$0xff] %v1529_v22  ;;  %2607 = vst [vmem:[#allocation2 + $0x690] sm:$0xff] %v2169_v23  ;;  %v1544_v26 = vadd.f32 %v4786_v13, %v3314_v24  ;;  %v2184_v27 = vadd.f32 %v4786_v13, %v3506_v25 }
 0x16f   :  { %v1538_v28 = vpop.f32.mrf.mxu0  ;;  %v2178_v29 = vpop.f32.mrf.mxu1 }
 0x170   :  { %2482 = vst [vmem:[#allocation2 + $0x2a8] sm:$0xff] %v1544_v26  ;;  %2610 = vst [vmem:[#allocation2 + $0x6a8] sm:$0xff] %v2184_v27  ;;  %v1539_v30 = vadd.f32 %v4786_v13, %v1538_v28  ;;  %v2179_v31 = vadd.f32 %v4786_v13, %v2178_v29 }
 0x171   :  { %v3317_v32 = vpop.f32.mrf.mxu0  ;;  %v3509_v33 = vpop.f32.mrf.mxu1 }
 0x172   :  { %2481 = vst [vmem:[#allocation2 + $0x2a0] sm:$0xff] %v1539_v30  ;;  %2609 = vst [vmem:[#allocation2 + $0x6a0] sm:$0xff] %v2179_v31  ;;  %v1554_v34 = vadd.f32 %v4786_v13, %v3317_v32  ;;  %v2194_v35 = vadd.f32 %v4786_v13, %v3509_v33 }
 0x173   :  { %v1548_v36 = vpop.f32.mrf.mxu0  ;;  %v2188_v37 = vpop.f32.mrf.mxu1 }
 0x174   :  { %2484 = vst [vmem:[#allocation2 + $0x2b8] sm:$0xff] %v1554_v34  ;;  %2612 = vst [vmem:[#allocation2 + $0x6b8] sm:$0xff] %v2194_v35  ;;  %v1549_v38 = vadd.f32 %v4786_v13, %v1548_v36  ;;  %v2189_v39 = vadd.f32 %v4786_v13, %v2188_v37 }
 0x175   :  { %v3320_v40 = vpop.f32.mrf.mxu0  ;;  %v3512_v41 = vpop.f32.mrf.mxu1 }
 0x176   :  { %2483 = vst [vmem:[#allocation2 + $0x2b0] sm:$0xff] %v1549_v38  ;;  %2611 = vst [vmem:[#allocation2 + $0x6b0] sm:$0xff] %v2189_v39  ;;  %v1564_v42 = vadd.f32 %v4786_v13, %v3320_v40  ;;  %v2204_v43 = vadd.f32 %v4786_v13, %v3512_v41 }
 0x177   :  { %v1558_v44 = vpop.f32.mrf.mxu0  ;;  %v2198_v45 = vpop.f32.mrf.mxu1 }
 0x178   :  { %2486 = vst [vmem:[#allocation2 + $0x2c8] sm:$0xff] %v1564_v42  ;;  %2614 = vst [vmem:[#allocation2 + $0x6c8] sm:$0xff] %v2204_v43  ;;  %v1559_v46 = vadd.f32 %v4786_v13, %v1558_v44  ;;  %v2199_v47 = vadd.f32 %v4786_v13, %v2198_v45 }
 0x179   :  { %v3323_v48 = vpop.f32.mrf.mxu0  ;;  %v3515_v49 = vpop.f32.mrf.mxu1 }
 0x17a   :  { %2485 = vst [vmem:[#allocation2 + $0x2c0] sm:$0xff] %v1559_v46  ;;  %2613 = vst [vmem:[#allocation2 + $0x6c0] sm:$0xff] %v2199_v47  ;;  %v1574_v50 = vadd.f32 %v4786_v13, %v3323_v48  ;;  %v2214_v51 = vadd.f32 %v4786_v13, %v3515_v49 }
 0x17b   :  { %v1568_v52 = vpop.f32.mrf.mxu0  ;;  %v2208_v53 = vpop.f32.mrf.mxu1 }
 0x17c   :  { %2488 = vst [vmem:[#allocation2 + $0x2d8] sm:$0xff] %v1574_v50  ;;  %2616 = vst [vmem:[#allocation2 + $0x6d8] sm:$0xff] %v2214_v51  ;;  %v1569_v54 = vadd.f32 %v4786_v13, %v1568_v52  ;;  %v2209_v55 = vadd.f32 %v4786_v13, %v2208_v53 }
 0x17d   :  { %v3326_v56 = vpop.f32.mrf.mxu0  ;;  %v3518_v57 = vpop.f32.mrf.mxu1 }
 0x17e   :  { %2487 = vst [vmem:[#allocation2 + $0x2d0] sm:$0xff] %v1569_v54  ;;  %2615 = vst [vmem:[#allocation2 + $0x6d0] sm:$0xff] %v2209_v55  ;;  %v1584_v58 = vadd.f32 %v4786_v13, %v3326_v56  ;;  %v2224_v59 = vadd.f32 %v4786_v13, %v3518_v57 }
 0x17f   :  { %v1578_v60 = vpop.f32.mrf.mxu0  ;;  %v2218_v61 = vpop.f32.mrf.mxu1 }
 0x180   :  { %2490 = vst [vmem:[#allocation2 + $0x2e8] sm:$0xff] %v1584_v58  ;;  %2618 = vst [vmem:[#allocation2 + $0x6e8] sm:$0xff] %v2224_v59  ;;  %v1579_v62 = vadd.f32 %v4786_v13, %v1578_v60  ;;  %v2219_v63 = vadd.f32 %v4786_v13, %v2218_v61 }
 0x181   :  { %v3329_v0 = vpop.f32.mrf.mxu0  ;;  %v3521_v1 = vpop.f32.mrf.mxu1 }
 0x182   :  { %2489 = vst [vmem:[#allocation2 + $0x2e0] sm:$0xff] %v1579_v62  ;;  %2617 = vst [vmem:[#allocation2 + $0x6e0] sm:$0xff] %v2219_v63  ;;  %v1594_v2 = vadd.f32 %v4786_v13, %v3329_v0  ;;  %v2234_v3 = vadd.f32 %v4786_v13, %v3521_v1 }
 0x183   :  { %v1588_v4 = vpop.f32.mrf.mxu0  ;;  %v2228_v6 = vpop.f32.mrf.mxu1 }
 0x184   :  { %2492 = vst [vmem:[#allocation2 + $0x2f8] sm:$0xff] %v1594_v2  ;;  %2620 = vst [vmem:[#allocation2 + $0x6f8] sm:$0xff] %v2234_v3  ;;  %v1589_v7 = vadd.f32 %v4786_v13, %v1588_v4  ;;  %v2229_v8 = vadd.f32 %v4786_v13, %v2228_v6 }
 0x185   :  { %v3332_v9 = vpop.f32.mrf.mxu0  ;;  %v3524_v10 = vpop.f32.mrf.mxu1 }
 0x186   :  { %2491 = vst [vmem:[#allocation2 + $0x2f0] sm:$0xff] %v1589_v7  ;;  %2619 = vst [vmem:[#allocation2 + $0x6f0] sm:$0xff] %v2229_v8  ;;  %v1604_v11 = vadd.f32 %v4786_v13, %v3332_v9  ;;  %v2244_v12 = vadd.f32 %v4786_v13, %v3524_v10 }
 0x187   :  { %v1598_v14 = vpop.f32.mrf.mxu0  ;;  %v2238_v15 = vpop.f32.mrf.mxu1 }
 0x188   :  { %2494 = vst [vmem:[#allocation2 + $0x308] sm:$0xff] %v1604_v11  ;;  %2622 = vst [vmem:[#allocation2 + $0x708] sm:$0xff] %v2244_v12  ;;  %v1599_v16 = vadd.f32 %v4786_v13, %v1598_v14  ;;  %v2239_v17 = vadd.f32 %v4786_v13, %v2238_v15 }
 0x189   :  { %v3335_v18 = vpop.f32.mrf.mxu0  ;;  %v3527_v5 = vpop.f32.mrf.mxu1 }
 0x18a   :  { %2493 = vst [vmem:[#allocation2 + $0x300] sm:$0xff] %v1599_v16  ;;  %2621 = vst [vmem:[#allocation2 + $0x700] sm:$0xff] %v2239_v17  ;;  %v1614_v19 = vadd.f32 %v4786_v13, %v3335_v18  ;;  %v2254_v20 = vadd.f32 %v4786_v13, %v3527_v5 }
 0x18b   :  { %v1608_v21 = vpop.f32.mrf.mxu0  ;;  %v2248_v22 = vpop.f32.mrf.mxu1 }
 0x18c   :  { %2496 = vst [vmem:[#allocation2 + $0x318] sm:$0xff] %v1614_v19  ;;  %2624 = vst [vmem:[#allocation2 + $0x718] sm:$0xff] %v2254_v20  ;;  %v1609_v23 = vadd.f32 %v4786_v13, %v1608_v21  ;;  %v2249_v24 = vadd.f32 %v4786_v13, %v2248_v22 }
 0x18d   :  { %v3338_v25 = vpop.f32.mrf.mxu0  ;;  %v3530_v26 = vpop.f32.mrf.mxu1 }
 0x18e   :  { %2495 = vst [vmem:[#allocation2 + $0x310] sm:$0xff] %v1609_v23  ;;  %2623 = vst [vmem:[#allocation2 + $0x710] sm:$0xff] %v2249_v24  ;;  %v1624_v27 = vadd.f32 %v4786_v13, %v3338_v25  ;;  %v2264_v28 = vadd.f32 %v4786_v13, %v3530_v26 }
 0x18f   :  { %v1618_v29 = vpop.f32.mrf.mxu0  ;;  %v2258_v30 = vpop.f32.mrf.mxu1 }
 0x190   :  { %2498 = vst [vmem:[#allocation2 + $0x328] sm:$0xff] %v1624_v27  ;;  %2626 = vst [vmem:[#allocation2 + $0x728] sm:$0xff] %v2264_v28  ;;  %v1619_v31 = vadd.f32 %v4786_v13, %v1618_v29  ;;  %v2259_v32 = vadd.f32 %v4786_v13, %v2258_v30 }
 0x191   :  { %v3341_v33 = vpop.f32.mrf.mxu0  ;;  %v3533_v34 = vpop.f32.mrf.mxu1 }
 0x192   :  { %2497 = vst [vmem:[#allocation2 + $0x320] sm:$0xff] %v1619_v31  ;;  %2625 = vst [vmem:[#allocation2 + $0x720] sm:$0xff] %v2259_v32  ;;  %v1634_v35 = vadd.f32 %v4786_v13, %v3341_v33  ;;  %v2274_v36 = vadd.f32 %v4786_v13, %v3533_v34 }
 0x193   :  { %v1628_v37 = vpop.f32.mrf.mxu0  ;;  %v2268_v38 = vpop.f32.mrf.mxu1 }
 0x194   :  { %2500 = vst [vmem:[#allocation2 + $0x338] sm:$0xff] %v1634_v35  ;;  %2628 = vst [vmem:[#allocation2 + $0x738] sm:$0xff] %v2274_v36  ;;  %v1629_v39 = vadd.f32 %v4786_v13, %v1628_v37  ;;  %v2269_v40 = vadd.f32 %v4786_v13, %v2268_v38 }
 0x195   :  { %v3344_v41 = vpop.f32.mrf.mxu0  ;;  %v3536_v42 = vpop.f32.mrf.mxu1 }
 0x196   :  { %2499 = vst [vmem:[#allocation2 + $0x330] sm:$0xff] %v1629_v39  ;;  %2627 = vst [vmem:[#allocation2 + $0x730] sm:$0xff] %v2269_v40  ;;  %v1644_v43 = vadd.f32 %v4786_v13, %v3344_v41  ;;  %v2284_v44 = vadd.f32 %v4786_v13, %v3536_v42 }
 0x197   :  { %v1638_v45 = vpop.f32.mrf.mxu0  ;;  %v2278_v46 = vpop.f32.mrf.mxu1 }
 0x198   :  { %2502 = vst [vmem:[#allocation2 + $0x348] sm:$0xff] %v1644_v43  ;;  %2630 = vst [vmem:[#allocation2 + $0x748] sm:$0xff] %v2284_v44  ;;  %v1639_v47 = vadd.f32 %v4786_v13, %v1638_v45  ;;  %v2279_v48 = vadd.f32 %v4786_v13, %v2278_v46 }
 0x199   :  { %v3347_v49 = vpop.f32.mrf.mxu0  ;;  %v3539_v50 = vpop.f32.mrf.mxu1 }
 0x19a   :  { %2501 = vst [vmem:[#allocation2 + $0x340] sm:$0xff] %v1639_v47  ;;  %2629 = vst [vmem:[#allocation2 + $0x740] sm:$0xff] %v2279_v48  ;;  %v1654_v51 = vadd.f32 %v4786_v13, %v3347_v49  ;;  %v2294_v52 = vadd.f32 %v4786_v13, %v3539_v50 }
 0x19b   :  { %v1648_v53 = vpop.f32.mrf.mxu0  ;;  %v2288_v54 = vpop.f32.mrf.mxu1 }
 0x19c   :  { %2504 = vst [vmem:[#allocation2 + $0x358] sm:$0xff] %v1654_v51  ;;  %2632 = vst [vmem:[#allocation2 + $0x758] sm:$0xff] %v2294_v52  ;;  %v1649_v55 = vadd.f32 %v4786_v13, %v1648_v53  ;;  %v2289_v56 = vadd.f32 %v4786_v13, %v2288_v54 }
 0x19d   :  { %v3350_v57 = vpop.f32.mrf.mxu0  ;;  %v3542_v58 = vpop.f32.mrf.mxu1 }
 0x19e   :  { %2503 = vst [vmem:[#allocation2 + $0x350] sm:$0xff] %v1649_v55  ;;  %2631 = vst [vmem:[#allocation2 + $0x750] sm:$0xff] %v2289_v56  ;;  %v1664_v59 = vadd.f32 %v4786_v13, %v3350_v57  ;;  %v2304_v60 = vadd.f32 %v4786_v13, %v3542_v58 }
 0x19f   :  { %v1658_v61 = vpop.f32.mrf.mxu0  ;;  %v2298_v62 = vpop.f32.mrf.mxu1 }
 0x1a0   :  { %2506 = vst [vmem:[#allocation2 + $0x368] sm:$0xff] %v1664_v59  ;;  %2634 = vst [vmem:[#allocation2 + $0x768] sm:$0xff] %v2304_v60  ;;  %v1659_v63 = vadd.f32 %v4786_v13, %v1658_v61  ;;  %v2299_v0 = vadd.f32 %v4786_v13, %v2298_v62 }
 0x1a1   :  { %v3353_v1 = vpop.f32.mrf.mxu0  ;;  %v3545_v2 = vpop.f32.mrf.mxu1 }
 0x1a2   :  { %2505 = vst [vmem:[#allocation2 + $0x360] sm:$0xff] %v1659_v63  ;;  %2633 = vst [vmem:[#allocation2 + $0x760] sm:$0xff] %v2299_v0  ;;  %v1674_v3 = vadd.f32 %v4786_v13, %v3353_v1  ;;  %v2314_v4 = vadd.f32 %v4786_v13, %v3545_v2 }
 0x1a3   :  { %v1668_v6 = vpop.f32.mrf.mxu0  ;;  %v2308_v7 = vpop.f32.mrf.mxu1 }
 0x1a4   :  { %2508 = vst [vmem:[#allocation2 + $0x378] sm:$0xff] %v1674_v3  ;;  %2636 = vst [vmem:[#allocation2 + $0x778] sm:$0xff] %v2314_v4  ;;  %v1669_v8 = vadd.f32 %v4786_v13, %v1668_v6  ;;  %v2309_v9 = vadd.f32 %v4786_v13, %v2308_v7 }
 0x1a5   :  { %v3356_v10 = vpop.f32.mrf.mxu0  ;;  %v3548_v11 = vpop.f32.mrf.mxu1 }
 0x1a6   :  { %2507 = vst [vmem:[#allocation2 + $0x370] sm:$0xff] %v1669_v8  ;;  %2635 = vst [vmem:[#allocation2 + $0x770] sm:$0xff] %v2309_v9  ;;  %v1684_v12 = vadd.f32 %v4786_v13, %v3356_v10  ;;  %v2324_v14 = vadd.f32 %v4786_v13, %v3548_v11 }
 0x1a7   :  { %v1678_v15 = vpop.f32.mrf.mxu0  ;;  %v2318_v16 = vpop.f32.mrf.mxu1 }
 0x1a8   :  { %2510 = vst [vmem:[#allocation2 + $0x388] sm:$0xff] %v1684_v12  ;;  %2638 = vst [vmem:[#allocation2 + $0x788] sm:$0xff] %v2324_v14  ;;  %v1679_v17 = vadd.f32 %v4786_v13, %v1678_v15  ;;  %v2319_v18 = vadd.f32 %v4786_v13, %v2318_v16 }
 0x1a9   :  { %v3359_v5 = vpop.f32.mrf.mxu0  ;;  %v3551_v19 = vpop.f32.mrf.mxu1 }
 0x1aa   :  { %2509 = vst [vmem:[#allocation2 + $0x380] sm:$0xff] %v1679_v17  ;;  %2637 = vst [vmem:[#allocation2 + $0x780] sm:$0xff] %v2319_v18  ;;  %v1694_v20 = vadd.f32 %v4786_v13, %v3359_v5  ;;  %v2334_v21 = vadd.f32 %v4786_v13, %v3551_v19 }
 0x1ab   :  { %v1688_v22 = vpop.f32.mrf.mxu0  ;;  %v2328_v23 = vpop.f32.mrf.mxu1 }
 0x1ac   :  { %2512 = vst [vmem:[#allocation2 + $0x398] sm:$0xff] %v1694_v20  ;;  %2640 = vst [vmem:[#allocation2 + $0x798] sm:$0xff] %v2334_v21  ;;  %v1689_v24 = vadd.f32 %v4786_v13, %v1688_v22  ;;  %v2329_v25 = vadd.f32 %v4786_v13, %v2328_v23 }
 0x1ad   :  { %v3362_v26 = vpop.f32.mrf.mxu0  ;;  %v3554_v27 = vpop.f32.mrf.mxu1 }
 0x1ae   :  { %2511 = vst [vmem:[#allocation2 + $0x390] sm:$0xff] %v1689_v24  ;;  %2639 = vst [vmem:[#allocation2 + $0x790] sm:$0xff] %v2329_v25  ;;  %v1704_v28 = vadd.f32 %v4786_v13, %v3362_v26  ;;  %v2344_v29 = vadd.f32 %v4786_v13, %v3554_v27 }
 0x1af   :  { %v1698_v30 = vpop.f32.mrf.mxu0  ;;  %v2338_v31 = vpop.f32.mrf.mxu1 }
 0x1b0   :  { %2514 = vst [vmem:[#allocation2 + $0x3a8] sm:$0xff] %v1704_v28  ;;  %2642 = vst [vmem:[#allocation2 + $0x7a8] sm:$0xff] %v2344_v29  ;;  %v1699_v32 = vadd.f32 %v4786_v13, %v1698_v30  ;;  %v2339_v33 = vadd.f32 %v4786_v13, %v2338_v31 }
 0x1b1   :  { %v3365_v34 = vpop.f32.mrf.mxu0  ;;  %v3557_v35 = vpop.f32.mrf.mxu1 }
 0x1b2   :  { %2513 = vst [vmem:[#allocation2 + $0x3a0] sm:$0xff] %v1699_v32  ;;  %2641 = vst [vmem:[#allocation2 + $0x7a0] sm:$0xff] %v2339_v33  ;;  %v1714_v36 = vadd.f32 %v4786_v13, %v3365_v34  ;;  %v2354_v37 = vadd.f32 %v4786_v13, %v3557_v35 }
 0x1b3   :  { %v1708_v38 = vpop.f32.mrf.mxu0  ;;  %v2348_v39 = vpop.f32.mrf.mxu1 }
 0x1b4   :  { %2516 = vst [vmem:[#allocation2 + $0x3b8] sm:$0xff] %v1714_v36  ;;  %2644 = vst [vmem:[#allocation2 + $0x7b8] sm:$0xff] %v2354_v37  ;;  %v1709_v40 = vadd.f32 %v4786_v13, %v1708_v38  ;;  %v2349_v41 = vadd.f32 %v4786_v13, %v2348_v39 }
 0x1b5   :  { %v3368_v42 = vpop.f32.mrf.mxu0  ;;  %v3560_v43 = vpop.f32.mrf.mxu1 }
 0x1b6   :  { %2515 = vst [vmem:[#allocation2 + $0x3b0] sm:$0xff] %v1709_v40  ;;  %2643 = vst [vmem:[#allocation2 + $0x7b0] sm:$0xff] %v2349_v41  ;;  %v1724_v44 = vadd.f32 %v4786_v13, %v3368_v42  ;;  %v2364_v45 = vadd.f32 %v4786_v13, %v3560_v43 }
 0x1b7   :  { %v1718_v46 = vpop.f32.mrf.mxu0  ;;  %v2358_v47 = vpop.f32.mrf.mxu1 }
 0x1b8   :  { %2518 = vst [vmem:[#allocation2 + $0x3c8] sm:$0xff] %v1724_v44  ;;  %2646 = vst [vmem:[#allocation2 + $0x7c8] sm:$0xff] %v2364_v45  ;;  %v1719_v48 = vadd.f32 %v4786_v13, %v1718_v46  ;;  %v2359_v49 = vadd.f32 %v4786_v13, %v2358_v47 }
 0x1b9   :  { %v3371_v50 = vpop.f32.mrf.mxu0  ;;  %v3563_v51 = vpop.f32.mrf.mxu1 }
 0x1ba   :  { %2517 = vst [vmem:[#allocation2 + $0x3c0] sm:$0xff] %v1719_v48  ;;  %2645 = vst [vmem:[#allocation2 + $0x7c0] sm:$0xff] %v2359_v49  ;;  %v1734_v52 = vadd.f32 %v4786_v13, %v3371_v50  ;;  %v2374_v53 = vadd.f32 %v4786_v13, %v3563_v51 }
 0x1bb   :  { %v1728_v54 = vpop.f32.mrf.mxu0  ;;  %v2368_v55 = vpop.f32.mrf.mxu1 }
 0x1bc   :  { %2520 = vst [vmem:[#allocation2 + $0x3d8] sm:$0xff] %v1734_v52  ;;  %2648 = vst [vmem:[#allocation2 + $0x7d8] sm:$0xff] %v2374_v53  ;;  %v1729_v56 = vadd.f32 %v4786_v13, %v1728_v54  ;;  %v2369_v57 = vadd.f32 %v4786_v13, %v2368_v55 }
 0x1bd   :  { %v3374_v58 = vpop.f32.mrf.mxu0  ;;  %v3566_v59 = vpop.f32.mrf.mxu1 }
 0x1be   :  { %2519 = vst [vmem:[#allocation2 + $0x3d0] sm:$0xff] %v1729_v56  ;;  %2647 = vst [vmem:[#allocation2 + $0x7d0] sm:$0xff] %v2369_v57  ;;  %v1744_v60 = vadd.f32 %v4786_v13, %v3374_v58  ;;  %v2384_v61 = vadd.f32 %v4786_v13, %v3566_v59 }
 0x1bf   :  { %v1738_v62 = vpop.f32.mrf.mxu0  ;;  %v2378_v63 = vpop.f32.mrf.mxu1 }
 0x1c0   :  { %2522 = vst [vmem:[#allocation2 + $0x3e8] sm:$0xff] %v1744_v60  ;;  %2650 = vst [vmem:[#allocation2 + $0x7e8] sm:$0xff] %v2384_v61  ;;  %v1739_v0 = vadd.f32 %v4786_v13, %v1738_v62  ;;  %v2379_v1 = vadd.f32 %v4786_v13, %v2378_v63 }
 0x1c1   :  { %v3377_v2 = vpop.f32.mrf.mxu0  ;;  %v3569_v3 = vpop.f32.mrf.mxu1 }
 0x1c2   :  { %2521 = vst [vmem:[#allocation2 + $0x3e0] sm:$0xff] %v1739_v0  ;;  %2649 = vst [vmem:[#allocation2 + $0x7e0] sm:$0xff] %v2379_v1  ;;  %v1754_v4 = vadd.f32 %v4786_v13, %v3377_v2  ;;  %v2394_v6 = vadd.f32 %v4786_v13, %v3569_v3 }
 0x1c3   :  { %v1748_v7 = vpop.f32.mrf.mxu0  ;;  %v2388_v8 = vpop.f32.mrf.mxu1 }
 0x1c4   :  { %2524 = vst [vmem:[#allocation2 + $0x3f8] sm:$0xff] %v1754_v4  ;;  %2652 = vst [vmem:[#allocation2 + $0x7f8] sm:$0xff] %v2394_v6  ;;  %v1749_v9 = vadd.f32 %v4786_v13, %v1748_v7  ;;  %v2389_v10 = vadd.f32 %v4786_v13, %v2388_v8 }
 0x1c6   :  { %2523 = vst [vmem:[#allocation2 + $0x3f0] sm:$0xff] %v1749_v9  ;;  %2651 = vst [vmem:[#allocation2 + $0x7f0] sm:$0xff] %v2389_v10 }
 0x1c7   :  { %3587 = shalt.err (!%p3584_p4)
}
 0x1c8   :  { %s3599_s26 = smov 128   ;;  %s3600_s27 = smov 8  }
 0x1c9   :  { %2664 = dma.vmem_to_hbm [thread:$0]  %s2659_s24, 32768, %s4920_s3, [#allocation3], %s3599_s26, %s3599_s26, %s3600_s27  }
 0x1ca   :  { %3596 = dma.done.wait [#allocation3], 32768  }
 0x1cb   :  { %3597 = vsyncadd [#allocation3], 4294934528 }
 0x1cc   :  { %2668 = vsyncpa [#allocation3], 1 }

</bundles_post_ra>
